<compile_context>
chip_gen: v5e
topology: v5e:2x2
jax: 0.10.0
libtpu: 0.0.40
codegen_flags: <defaults>
</compile_context>

<pallas_src>
import functools

import jax
import jax.numpy as jnp
from jax.experimental import pallas as pl
from jax.experimental.pallas import tpu as pltpu


def _round_up(x, m):
    return (x + m - 1) // m * m


def _fused_lstm_kernel(n_layers, T, B, H, *refs):
    """Fused multi-layer LSTM forward; whole sequence handled in one grid step.

    refs layout:
      refs[0]                  : x2d    (T*B, E)          embedded input, flattened
      refs[1 + 3*l + 0]        : W_ih^T (in_dim_l, 4H)    layer-l input weights
      refs[1 + 3*l + 1]        : W_hh^T (H, 4H)           layer-l recurrent weights
      refs[1 + 3*l + 2]        : bias   (1, 4H)           b_ih + b_hh, layer l
      refs[1 + 3*n_layers + 0] : hseq2d (T*B, H)          out: last layer h per step
      refs[1 + 3*n_layers + 1] : hfin   (n_layers, B, H)  out: final h per layer
      refs[1 + 3*n_layers + 2] : cfin   (n_layers, B, H)  out: final c per layer
    """
    x_ref = refs[0]
    o = 1 + 3 * n_layers
    hseq_ref, hfin_ref, cfin_ref = refs[o], refs[o + 1], refs[o + 2]

    for l in range(n_layers):
        wih_ref, whh_ref, b_ref = refs[1 + 3 * l: 4 + 3 * l]

        # (1) Batched input projection for all timesteps at once (no serial
        #     dependence) with the combined bias folded in: one MXU matmul.
        #     Layer 0 reads the embedded input; layer l>0 reads the previous
        #     layer's full hidden sequence, which was written to hseq_ref.
        x_in = x_ref[...] if l == 0 else hseq_ref[...]
        gates_x = (jnp.dot(x_in, wih_ref[...],
                           preferred_element_type=jnp.float32)
                   + b_ref[...])                              # (T*B, 4H)

        whh = whh_ref[...]                                    # (H, 4H), hoisted

        # (2) Serial recurrence: only h @ W_hh + elementwise per step.
        h = jnp.zeros((B, H), jnp.float32)
        c = jnp.zeros((B, H), jnp.float32)
        for t in range(T):                                    # fully unrolled
            g = (gates_x[t * B:(t + 1) * B, :]
                 + jnp.dot(h, whh, preferred_element_type=jnp.float32))
            # PyTorch gate order: i, f, g, o
            i_g = jax.nn.sigmoid(g[:, 0 * H:1 * H])
            f_g = jax.nn.sigmoid(g[:, 1 * H:2 * H])
            g_g = jnp.tanh(g[:, 2 * H:3 * H])
            o_g = jax.nn.sigmoid(g[:, 3 * H:4 * H])
            c = f_g * c + i_g * g_g
            h = o_g * jnp.tanh(c)
            hseq_ref[pl.ds(t * B, B), :] = h                  # sublane-aligned store

        hfin_ref[l] = h
        cfin_ref[l] = c


def lstm_forward(x_emb, layers):
    """Run the full n_layers LSTM stack over x_emb (T, B, E) with zero init state.

    layers: list of (w_ih (4H,in), w_hh (4H,H), b_ih (4H,), b_hh (4H,)) per layer
            (PyTorch nn.LSTM conventions).
    Returns (h_seq (T,B,H), h_final (n_layers,B,H), c_final (n_layers,B,H)).
    """
    T, B, E = x_emb.shape
    n_layers = len(layers)
    H = layers[0][1].shape[1]

    # Pad batch to a sublane multiple so gate tiles are (8, 128)-aligned and
    # h_seq stores are unmasked; padded rows are discarded in the wrapper.
    B_pad = max(_round_up(B, 8), 8)
    x = x_emb.astype(jnp.float32)
    if B_pad != B:
        x = jnp.pad(x, ((0, 0), (0, B_pad - B), (0, 0)))
    x2d = x.reshape(T * B_pad, E)                             # lane-dense slab

    inputs = [x2d]
    in_specs = [pl.BlockSpec((T * B_pad, E), lambda i: (0, 0))]
    for (w_ih, w_hh, b_ih, b_hh) in layers:
        in_dim = w_ih.shape[1]
        inputs.append(jnp.asarray(w_ih, jnp.float32).T)       # (in_dim, 4H)
        inputs.append(jnp.asarray(w_hh, jnp.float32).T)       # (H, 4H)
        inputs.append((jnp.asarray(b_ih, jnp.float32)
                       + jnp.asarray(b_hh, jnp.float32)).reshape(1, 4 * H))
        in_specs.append(pl.BlockSpec((in_dim, 4 * H), lambda i: (0, 0)))
        in_specs.append(pl.BlockSpec((H, 4 * H), lambda i: (0, 0)))
        in_specs.append(pl.BlockSpec((1, 4 * H), lambda i: (0, 0)))

    out_shapes = (
        jax.ShapeDtypeStruct((T * B_pad, H), jnp.float32),        # h_seq slab
        jax.ShapeDtypeStruct((n_layers, B_pad, H), jnp.float32),  # final h
        jax.ShapeDtypeStruct((n_layers, B_pad, H), jnp.float32),  # final c
    )
    out_specs = [
        pl.BlockSpec((T * B_pad, H), lambda i: (0, 0)),
        pl.BlockSpec((n_layers, B_pad, H), lambda i: (0, 0, 0)),
        pl.BlockSpec((n_layers, B_pad, H), lambda i: (0, 0, 0)),
    ]

    grid_spec = pltpu.PrefetchScalarGridSpec(
        num_scalar_prefetch=0,
        grid=(1,),            # whole recurrence runs inside one grid step
        in_specs=in_specs,
        out_specs=out_specs,
    )

    kernel = functools.partial(_fused_lstm_kernel, n_layers, T, B_pad, H)

    hseq2d, hfin, cfin = pl.pallas_call(
        kernel,
        out_shape=out_shapes,
        grid_spec=grid_spec,
        compiler_params=pltpu.CompilerParams(
            dimension_semantics=("arbitrary",)),
    )(*inputs)

    h_seq = hseq2d.reshape(T, B_pad, H)[:, :B, :]
    return h_seq, hfin[:, :B, :], cfin[:, :B, :]


def init_params(key, input_dim, embed_dim, latent_dim, n_layers):
    """Deterministic parameters matching nn.Embedding + nn.LSTM shapes."""
    keys = jax.random.split(key, 1 + 4 * n_layers)
    # nn.Embedding(input_dim, embed_dim, padding_idx=0): N(0,1), row 0 zeroed.
    emb = jax.random.normal(keys[0], (input_dim, embed_dim), jnp.float32)
    emb = emb.at[0].set(0.0)

    bound = 1.0 / jnp.sqrt(jnp.float32(latent_dim))
    layers = []
    for l in range(n_layers):
        in_dim = embed_dim if l == 0 else latent_dim
        k_wih, k_whh, k_bih, k_bhh = keys[1 + 4 * l: 1 + 4 * (l + 1)]
        w_ih = jax.random.uniform(k_wih, (4 * latent_dim, in_dim),
                                  jnp.float32, -bound, bound)
        w_hh = jax.random.uniform(k_whh, (4 * latent_dim, latent_dim),
                                  jnp.float32, -bound, bound)
        b_ih = jax.random.uniform(k_bih, (4 * latent_dim,),
                                  jnp.float32, -bound, bound)
        b_hh = jax.random.uniform(k_bhh, (4 * latent_dim,),
                                  jnp.float32, -bound, bound)
        layers.append((w_ih, w_hh, b_ih, b_hh))
    return emb, layers


@jax.jit
def encoder_tagging_forward(x_seqs, emb, layers):
    """Pallas-backed forward: x_seqs (T, B) int -> (h_last_layer, (h, c))."""
    x = jnp.take(emb, x_seqs.astype(jnp.int32), axis=0)       # (T, B, E) glue
    h_seq, h, c = lstm_forward(x, layers)
    return h_seq, (h, c)


def _reference_forward(x_seqs, emb, layers):
    """Pure-JAX reference (lax.scan LSTM) for verification."""
    x = jnp.take(emb, x_seqs.astype(jnp.int32), axis=0)
    h_fs, c_fs = [], []
    for (w_ih, w_hh, b_ih, b_hh) in layers:
        H = w_hh.shape[1]
        B = x.shape[1]

        def step(carry, x_t, w_ih=w_ih, w_hh=w_hh, b_ih=b_ih, b_hh=b_hh, H=H):
            h, c = carry
            gates = x_t @ w_ih.T + h @ w_hh.T + b_ih + b_hh
            i = jax.nn.sigmoid(gates[:, 0 * H:1 * H])
            f = jax.nn.sigmoid(gates[:, 1 * H:2 * H])
            g = jnp.tanh(gates[:, 2 * H:3 * H])
            o = jax.nn.sigmoid(gates[:, 3 * H:4 * H])
            c = f * c + i * g
            h = o * jnp.tanh(c)
            return (h, c), h

        init = (jnp.zeros((B, H), jnp.float32), jnp.zeros((B, H), jnp.float32))
        (h_f, c_f), hs = jax.lax.scan(step, init, x)
        x = hs
        h_fs.append(h_f)
        c_fs.append(c_f)
    return x, (jnp.stack(h_fs, 0), jnp.stack(c_fs, 0))


if __name__ == "__main__":
    # Small shapes consistent with the module's forward:
    # x_seqs: (seq_len=8, batch=4) token ids in [0, input_dim).
    input_dim = 16     # vocab
    embed_dim = 32
    latent_dim = 32
    n_layers = 2
    T, B = 8, 4

    key = jax.random.PRNGKey(0)
    k_data, k_params = jax.random.split(key)
    x_seqs = jax.random.randint(k_data, (T, B), 0, input_dim, dtype=jnp.int32)

    emb, layers = init_params(k_params, input_dim, embed_dim, latent_dim, n_layers)

    h_last_layer, (h, c) = encoder_tagging_forward(x_seqs, emb, layers)
    jax.block_until_ready((h_last_layer, h, c))

    # Sanity check against pure-JAX reference.
    ref_hll, (ref_h, ref_c) = _reference_forward(x_seqs, emb, layers)
    assert h_last_layer.shape == (T, B, latent_dim)
    assert h.shape == (n_layers, B, latent_dim) and c.shape == (n_layers, B, latent_dim)
    assert jnp.allclose(h_last_layer, ref_hll, atol=1e-5, rtol=1e-5)
    assert jnp.allclose(h, ref_h, atol=1e-5, rtol=1e-5)
    assert jnp.allclose(c, ref_c, atol=1e-5, rtol=1e-5)

    print("KERNEL_OK")
</pallas_src>

<mosaic_0001>
module attributes {stable_mosaic.version = 11 : i64} {
  func.func @_fused_lstm_kernel(%arg0: i32, %arg1: memref<64x32xf32, #tpu.memory_space<vmem>>, %arg2: memref<32x128xf32, #tpu.memory_space<vmem>>, %arg3: memref<32x128xf32, #tpu.memory_space<vmem>>, %arg4: memref<1x128xf32, #tpu.memory_space<vmem>>, %arg5: memref<32x128xf32, #tpu.memory_space<vmem>>, %arg6: memref<32x128xf32, #tpu.memory_space<vmem>>, %arg7: memref<1x128xf32, #tpu.memory_space<vmem>>, %arg8: memref<64x32xf32, #tpu.memory_space<vmem>>, %arg9: memref<2x8x32xf32, #tpu.memory_space<vmem>>, %arg10: memref<2x8x32xf32, #tpu.memory_space<vmem>>) attributes {dimension_semantics = [#tpu.dimension_semantics<arbitrary>], iteration_bounds = array<i64: 1>, scalar_prefetch = 0 : i64, scratch_operands = 0 : i64, tpu.core_type = #tpu.core_type<tc>, window_params = [{pipeline_mode = #tpu.pipeline_mode<synchronous>, transform_indices = @transform_0, window_bounds = array<i64: 64, 32>}, {pipeline_mode = #tpu.pipeline_mode<synchronous>, transform_indices = @transform_1, window_bounds = array<i64: 32, 128>}, {pipeline_mode = #tpu.pipeline_mode<synchronous>, transform_indices = @transform_2, window_bounds = array<i64: 32, 128>}, {pipeline_mode = #tpu.pipeline_mode<synchronous>, transform_indices = @transform_3, window_bounds = array<i64: 1, 128>}, {pipeline_mode = #tpu.pipeline_mode<synchronous>, transform_indices = @transform_4, window_bounds = array<i64: 32, 128>}, {pipeline_mode = #tpu.pipeline_mode<synchronous>, transform_indices = @transform_5, window_bounds = array<i64: 32, 128>}, {pipeline_mode = #tpu.pipeline_mode<synchronous>, transform_indices = @transform_6, window_bounds = array<i64: 1, 128>}, {pipeline_mode = #tpu.pipeline_mode<synchronous>, transform_indices = @transform_7, window_bounds = array<i64: 64, 32>}, {pipeline_mode = #tpu.pipeline_mode<synchronous>, transform_indices = @transform_8, window_bounds = array<i64: 2, 8, 32>}, {pipeline_mode = #tpu.pipeline_mode<synchronous>, transform_indices = @transform_9, window_bounds = array<i64: 2, 8, 32>}]} {
    %c0 = arith.constant 0 : index
    %c0_0 = arith.constant 0 : index
    %0 = vector.load %arg1[%c0, %c0_0] : memref<64x32xf32, #tpu.memory_space<vmem>>, vector<64x32xf32>
    %c0_1 = arith.constant 0 : index
    %c0_2 = arith.constant 0 : index
    %1 = vector.load %arg2[%c0_1, %c0_2] : memref<32x128xf32, #tpu.memory_space<vmem>>, vector<32x128xf32>
    %cst = arith.constant dense<0.000000e+00> : vector<64x128xf32>
    %2 = tpu.matmul %0, %1, %cst {dimension_numbers = #tpu.dot_dimension_numbers<[1], [0], [0], [1], [0, 0, 1, 1], [], []>} : vector<64x32xf32>, vector<32x128xf32>, vector<64x128xf32> -> vector<64x128xf32>
    %c0_3 = arith.constant 0 : index
    %c0_4 = arith.constant 0 : index
    %3 = vector.load %arg4[%c0_3, %c0_4] : memref<1x128xf32, #tpu.memory_space<vmem>>, vector<1x128xf32>
    %4 = vector.broadcast %3 : vector<1x128xf32> to vector<64x128xf32>
    %5 = arith.addf %2, %4 : vector<64x128xf32>
    %c0_5 = arith.constant 0 : index
    %c0_6 = arith.constant 0 : index
    %6 = vector.load %arg3[%c0_5, %c0_6] : memref<32x128xf32, #tpu.memory_space<vmem>>, vector<32x128xf32>
    %cst_7 = arith.constant 0.000000e+00 : f32
    %7 = vector.broadcast %cst_7 : f32 to vector<8x32xf32>
    %cst_8 = arith.constant 0.000000e+00 : f32
    %8 = vector.broadcast %cst_8 : f32 to vector<8x32xf32>
    %9 = vector.extract_strided_slice %5 {offsets = [0, 0], sizes = [8, 128], strides = [1, 1]} : vector<64x128xf32> to vector<8x128xf32>
    %cst_9 = arith.constant dense<0.000000e+00> : vector<8x128xf32>
    %10 = tpu.matmul %7, %6, %cst_9 {dimension_numbers = #tpu.dot_dimension_numbers<[1], [0], [0], [1], [0, 0, 1, 1], [], []>} : vector<8x32xf32>, vector<32x128xf32>, vector<8x128xf32> -> vector<8x128xf32>
    %11 = arith.addf %9, %10 : vector<8x128xf32>
    %12 = vector.extract_strided_slice %11 {offsets = [0, 0], sizes = [8, 32], strides = [1, 1]} : vector<8x128xf32> to vector<8x32xf32>
    %13 = arith.negf %12 : vector<8x32xf32>
    %14 = math.exp %13 : vector<8x32xf32>
    %cst_10 = arith.constant 1.000000e+00 : f32
    %15 = vector.broadcast %cst_10 : f32 to vector<8x32xf32>
    %16 = arith.addf %15, %14 : vector<8x32xf32>
    %17 = arith.divf %15, %16 : vector<8x32xf32>
    %18 = vector.extract_strided_slice %11 {offsets = [0, 32], sizes = [8, 32], strides = [1, 1]} : vector<8x128xf32> to vector<8x32xf32>
    %19 = arith.negf %18 : vector<8x32xf32>
    %20 = math.exp %19 : vector<8x32xf32>
    %cst_11 = arith.constant 1.000000e+00 : f32
    %21 = vector.broadcast %cst_11 : f32 to vector<8x32xf32>
    %22 = arith.addf %21, %20 : vector<8x32xf32>
    %23 = arith.divf %21, %22 : vector<8x32xf32>
    %24 = vector.extract_strided_slice %11 {offsets = [0, 64], sizes = [8, 32], strides = [1, 1]} : vector<8x128xf32> to vector<8x32xf32>
    %25 = math.tanh %24 : vector<8x32xf32>
    %26 = vector.extract_strided_slice %11 {offsets = [0, 96], sizes = [8, 32], strides = [1, 1]} : vector<8x128xf32> to vector<8x32xf32>
    %27 = arith.negf %26 : vector<8x32xf32>
    %28 = math.exp %27 : vector<8x32xf32>
    %cst_12 = arith.constant 1.000000e+00 : f32
    %29 = vector.broadcast %cst_12 : f32 to vector<8x32xf32>
    %30 = arith.addf %29, %28 : vector<8x32xf32>
    %31 = arith.divf %29, %30 : vector<8x32xf32>
    %32 = arith.mulf %23, %8 : vector<8x32xf32>
    %33 = arith.mulf %17, %25 : vector<8x32xf32>
    %34 = arith.addf %32, %33 : vector<8x32xf32>
    %35 = math.tanh %34 : vector<8x32xf32>
    %36 = arith.mulf %31, %35 : vector<8x32xf32>
    %c0_13 = arith.constant 0 : index
    %c0_14 = arith.constant 0 : index
    %37 = vector.load %arg8[%c0_13, %c0_14] : memref<64x32xf32, #tpu.memory_space<vmem>>, vector<8x32xf32>
    tpu.vector_store %arg8[%c0_13, %c0_14], %36 {strides = array<i32>} : memref<64x32xf32, #tpu.memory_space<vmem>>, vector<8x32xf32>,
    %38 = vector.extract_strided_slice %5 {offsets = [8, 0], sizes = [8, 128], strides = [1, 1]} : vector<64x128xf32> to vector<8x128xf32>
    %cst_15 = arith.constant dense<0.000000e+00> : vector<8x128xf32>
    %39 = tpu.matmul %36, %6, %cst_15 {dimension_numbers = #tpu.dot_dimension_numbers<[1], [0], [0], [1], [0, 0, 1, 1], [], []>} : vector<8x32xf32>, vector<32x128xf32>, vector<8x128xf32> -> vector<8x128xf32>
    %40 = arith.addf %38, %39 : vector<8x128xf32>
    %41 = vector.extract_strided_slice %40 {offsets = [0, 0], sizes = [8, 32], strides = [1, 1]} : vector<8x128xf32> to vector<8x32xf32>
    %42 = arith.negf %41 : vector<8x32xf32>
    %43 = math.exp %42 : vector<8x32xf32>
    %cst_16 = arith.constant 1.000000e+00 : f32
    %44 = vector.broadcast %cst_16 : f32 to vector<8x32xf32>
    %45 = arith.addf %44, %43 : vector<8x32xf32>
    %46 = arith.divf %44, %45 : vector<8x32xf32>
    %47 = vector.extract_strided_slice %40 {offsets = [0, 32], sizes = [8, 32], strides = [1, 1]} : vector<8x128xf32> to vector<8x32xf32>
    %48 = arith.negf %47 : vector<8x32xf32>
    %49 = math.exp %48 : vector<8x32xf32>
    %cst_17 = arith.constant 1.000000e+00 : f32
    %50 = vector.broadcast %cst_17 : f32 to vector<8x32xf32>
    %51 = arith.addf %50, %49 : vector<8x32xf32>
    %52 = arith.divf %50, %51 : vector<8x32xf32>
    %53 = vector.extract_strided_slice %40 {offsets = [0, 64], sizes = [8, 32], strides = [1, 1]} : vector<8x128xf32> to vector<8x32xf32>
    %54 = math.tanh %53 : vector<8x32xf32>
    %55 = vector.extract_strided_slice %40 {offsets = [0, 96], sizes = [8, 32], strides = [1, 1]} : vector<8x128xf32> to vector<8x32xf32>
    %56 = arith.negf %55 : vector<8x32xf32>
    %57 = math.exp %56 : vector<8x32xf32>
    %cst_18 = arith.constant 1.000000e+00 : f32
    %58 = vector.broadcast %cst_18 : f32 to vector<8x32xf32>
    %59 = arith.addf %58, %57 : vector<8x32xf32>
    %60 = arith.divf %58, %59 : vector<8x32xf32>
    %61 = arith.mulf %52, %34 : vector<8x32xf32>
    %62 = arith.mulf %46, %54 : vector<8x32xf32>
    %63 = arith.addf %61, %62 : vector<8x32xf32>
    %64 = math.tanh %63 : vector<8x32xf32>
    %65 = arith.mulf %60, %64 : vector<8x32xf32>
    %c8 = arith.constant 8 : index
    %c0_19 = arith.constant 0 : index
    %66 = vector.load %arg8[%c8, %c0_19] : memref<64x32xf32, #tpu.memory_space<vmem>>, vector<8x32xf32>
    tpu.vector_store %arg8[%c8, %c0_19], %65 {strides = array<i32>} : memref<64x32xf32, #tpu.memory_space<vmem>>, vector<8x32xf32>,
    %67 = vector.extract_strided_slice %5 {offsets = [16, 0], sizes = [8, 128], strides = [1, 1]} : vector<64x128xf32> to vector<8x128xf32>
    %cst_20 = arith.constant dense<0.000000e+00> : vector<8x128xf32>
    %68 = tpu.matmul %65, %6, %cst_20 {dimension_numbers = #tpu.dot_dimension_numbers<[1], [0], [0], [1], [0, 0, 1, 1], [], []>} : vector<8x32xf32>, vector<32x128xf32>, vector<8x128xf32> -> vector<8x128xf32>
    %69 = arith.addf %67, %68 : vector<8x128xf32>
    %70 = vector.extract_strided_slice %69 {offsets = [0, 0], sizes = [8, 32], strides = [1, 1]} : vector<8x128xf32> to vector<8x32xf32>
    %71 = arith.negf %70 : vector<8x32xf32>
    %72 = math.exp %71 : vector<8x32xf32>
    %cst_21 = arith.constant 1.000000e+00 : f32
    %73 = vector.broadcast %cst_21 : f32 to vector<8x32xf32>
    %74 = arith.addf %73, %72 : vector<8x32xf32>
    %75 = arith.divf %73, %74 : vector<8x32xf32>
    %76 = vector.extract_strided_slice %69 {offsets = [0, 32], sizes = [8, 32], strides = [1, 1]} : vector<8x128xf32> to vector<8x32xf32>
    %77 = arith.negf %76 : vector<8x32xf32>
    %78 = math.exp %77 : vector<8x32xf32>
    %cst_22 = arith.constant 1.000000e+00 : f32
    %79 = vector.broadcast %cst_22 : f32 to vector<8x32xf32>
    %80 = arith.addf %79, %78 : vector<8x32xf32>
    %81 = arith.divf %79, %80 : vector<8x32xf32>
    %82 = vector.extract_strided_slice %69 {offsets = [0, 64], sizes = [8, 32], strides = [1, 1]} : vector<8x128xf32> to vector<8x32xf32>
    %83 = math.tanh %82 : vector<8x32xf32>
    %84 = vector.extract_strided_slice %69 {offsets = [0, 96], sizes = [8, 32], strides = [1, 1]} : vector<8x128xf32> to vector<8x32xf32>
    %85 = arith.negf %84 : vector<8x32xf32>
    %86 = math.exp %85 : vector<8x32xf32>
    %cst_23 = arith.constant 1.000000e+00 : f32
    %87 = vector.broadcast %cst_23 : f32 to vector<8x32xf32>
    %88 = arith.addf %87, %86 : vector<8x32xf32>
    %89 = arith.divf %87, %88 : vector<8x32xf32>
    %90 = arith.mulf %81, %63 : vector<8x32xf32>
    %91 = arith.mulf %75, %83 : vector<8x32xf32>
    %92 = arith.addf %90, %91 : vector<8x32xf32>
    %93 = math.tanh %92 : vector<8x32xf32>
    %94 = arith.mulf %89, %93 : vector<8x32xf32>
    %c16 = arith.constant 16 : index
    %c0_24 = arith.constant 0 : index
    %95 = vector.load %arg8[%c16, %c0_24] : memref<64x32xf32, #tpu.memory_space<vmem>>, vector<8x32xf32>
    tpu.vector_store %arg8[%c16, %c0_24], %94 {strides = array<i32>} : memref<64x32xf32, #tpu.memory_space<vmem>>, vector<8x32xf32>,
    %96 = vector.extract_strided_slice %5 {offsets = [24, 0], sizes = [8, 128], strides = [1, 1]} : vector<64x128xf32> to vector<8x128xf32>
    %cst_25 = arith.constant dense<0.000000e+00> : vector<8x128xf32>
    %97 = tpu.matmul %94, %6, %cst_25 {dimension_numbers = #tpu.dot_dimension_numbers<[1], [0], [0], [1], [0, 0, 1, 1], [], []>} : vector<8x32xf32>, vector<32x128xf32>, vector<8x128xf32> -> vector<8x128xf32>
    %98 = arith.addf %96, %97 : vector<8x128xf32>
    %99 = vector.extract_strided_slice %98 {offsets = [0, 0], sizes = [8, 32], strides = [1, 1]} : vector<8x128xf32> to vector<8x32xf32>
    %100 = arith.negf %99 : vector<8x32xf32>
    %101 = math.exp %100 : vector<8x32xf32>
    %cst_26 = arith.constant 1.000000e+00 : f32
    %102 = vector.broadcast %cst_26 : f32 to vector<8x32xf32>
    %103 = arith.addf %102, %101 : vector<8x32xf32>
    %104 = arith.divf %102, %103 : vector<8x32xf32>
    %105 = vector.extract_strided_slice %98 {offsets = [0, 32], sizes = [8, 32], strides = [1, 1]} : vector<8x128xf32> to vector<8x32xf32>
    %106 = arith.negf %105 : vector<8x32xf32>
    %107 = math.exp %106 : vector<8x32xf32>
    %cst_27 = arith.constant 1.000000e+00 : f32
    %108 = vector.broadcast %cst_27 : f32 to vector<8x32xf32>
    %109 = arith.addf %108, %107 : vector<8x32xf32>
    %110 = arith.divf %108, %109 : vector<8x32xf32>
    %111 = vector.extract_strided_slice %98 {offsets = [0, 64], sizes = [8, 32], strides = [1, 1]} : vector<8x128xf32> to vector<8x32xf32>
    %112 = math.tanh %111 : vector<8x32xf32>
    %113 = vector.extract_strided_slice %98 {offsets = [0, 96], sizes = [8, 32], strides = [1, 1]} : vector<8x128xf32> to vector<8x32xf32>
    %114 = arith.negf %113 : vector<8x32xf32>
    %115 = math.exp %114 : vector<8x32xf32>
    %cst_28 = arith.constant 1.000000e+00 : f32
    %116 = vector.broadcast %cst_28 : f32 to vector<8x32xf32>
    %117 = arith.addf %116, %115 : vector<8x32xf32>
    %118 = arith.divf %116, %117 : vector<8x32xf32>
    %119 = arith.mulf %110, %92 : vector<8x32xf32>
    %120 = arith.mulf %104, %112 : vector<8x32xf32>
    %121 = arith.addf %119, %120 : vector<8x32xf32>
    %122 = math.tanh %121 : vector<8x32xf32>
    %123 = arith.mulf %118, %122 : vector<8x32xf32>
    %c24 = arith.constant 24 : index
    %c0_29 = arith.constant 0 : index
    %124 = vector.load %arg8[%c24, %c0_29] : memref<64x32xf32, #tpu.memory_space<vmem>>, vector<8x32xf32>
    tpu.vector_store %arg8[%c24, %c0_29], %123 {strides = array<i32>} : memref<64x32xf32, #tpu.memory_space<vmem>>, vector<8x32xf32>,
    %125 = vector.extract_strided_slice %5 {offsets = [32, 0], sizes = [8, 128], strides = [1, 1]} : vector<64x128xf32> to vector<8x128xf32>
    %cst_30 = arith.constant dense<0.000000e+00> : vector<8x128xf32>
    %126 = tpu.matmul %123, %6, %cst_30 {dimension_numbers = #tpu.dot_dimension_numbers<[1], [0], [0], [1], [0, 0, 1, 1], [], []>} : vector<8x32xf32>, vector<32x128xf32>, vector<8x128xf32> -> vector<8x128xf32>
    %127 = arith.addf %125, %126 : vector<8x128xf32>
    %128 = vector.extract_strided_slice %127 {offsets = [0, 0], sizes = [8, 32], strides = [1, 1]} : vector<8x128xf32> to vector<8x32xf32>
    %129 = arith.negf %128 : vector<8x32xf32>
    %130 = math.exp %129 : vector<8x32xf32>
    %cst_31 = arith.constant 1.000000e+00 : f32
    %131 = vector.broadcast %cst_31 : f32 to vector<8x32xf32>
    %132 = arith.addf %131, %130 : vector<8x32xf32>
    %133 = arith.divf %131, %132 : vector<8x32xf32>
    %134 = vector.extract_strided_slice %127 {offsets = [0, 32], sizes = [8, 32], strides = [1, 1]} : vector<8x128xf32> to vector<8x32xf32>
    %135 = arith.negf %134 : vector<8x32xf32>
    %136 = math.exp %135 : vector<8x32xf32>
    %cst_32 = arith.constant 1.000000e+00 : f32
    %137 = vector.broadcast %cst_32 : f32 to vector<8x32xf32>
    %138 = arith.addf %137, %136 : vector<8x32xf32>
    %139 = arith.divf %137, %138 : vector<8x32xf32>
    %140 = vector.extract_strided_slice %127 {offsets = [0, 64], sizes = [8, 32], strides = [1, 1]} : vector<8x128xf32> to vector<8x32xf32>
    %141 = math.tanh %140 : vector<8x32xf32>
    %142 = vector.extract_strided_slice %127 {offsets = [0, 96], sizes = [8, 32], strides = [1, 1]} : vector<8x128xf32> to vector<8x32xf32>
    %143 = arith.negf %142 : vector<8x32xf32>
    %144 = math.exp %143 : vector<8x32xf32>
    %cst_33 = arith.constant 1.000000e+00 : f32
    %145 = vector.broadcast %cst_33 : f32 to vector<8x32xf32>
    %146 = arith.addf %145, %144 : vector<8x32xf32>
    %147 = arith.divf %145, %146 : vector<8x32xf32>
    %148 = arith.mulf %139, %121 : vector<8x32xf32>
    %149 = arith.mulf %133, %141 : vector<8x32xf32>
    %150 = arith.addf %148, %149 : vector<8x32xf32>
    %151 = math.tanh %150 : vector<8x32xf32>
    %152 = arith.mulf %147, %151 : vector<8x32xf32>
    %c32 = arith.constant 32 : index
    %c0_34 = arith.constant 0 : index
    %153 = vector.load %arg8[%c32, %c0_34] : memref<64x32xf32, #tpu.memory_space<vmem>>, vector<8x32xf32>
    tpu.vector_store %arg8[%c32, %c0_34], %152 {strides = array<i32>} : memref<64x32xf32, #tpu.memory_space<vmem>>, vector<8x32xf32>,
    %154 = vector.extract_strided_slice %5 {offsets = [40, 0], sizes = [8, 128], strides = [1, 1]} : vector<64x128xf32> to vector<8x128xf32>
    %cst_35 = arith.constant dense<0.000000e+00> : vector<8x128xf32>
    %155 = tpu.matmul %152, %6, %cst_35 {dimension_numbers = #tpu.dot_dimension_numbers<[1], [0], [0], [1], [0, 0, 1, 1], [], []>} : vector<8x32xf32>, vector<32x128xf32>, vector<8x128xf32> -> vector<8x128xf32>
    %156 = arith.addf %154, %155 : vector<8x128xf32>
    %157 = vector.extract_strided_slice %156 {offsets = [0, 0], sizes = [8, 32], strides = [1, 1]} : vector<8x128xf32> to vector<8x32xf32>
    %158 = arith.negf %157 : vector<8x32xf32>
    %159 = math.exp %158 : vector<8x32xf32>
    %cst_36 = arith.constant 1.000000e+00 : f32
    %160 = vector.broadcast %cst_36 : f32 to vector<8x32xf32>
    %161 = arith.addf %160, %159 : vector<8x32xf32>
    %162 = arith.divf %160, %161 : vector<8x32xf32>
    %163 = vector.extract_strided_slice %156 {offsets = [0, 32], sizes = [8, 32], strides = [1, 1]} : vector<8x128xf32> to vector<8x32xf32>
    %164 = arith.negf %163 : vector<8x32xf32>
    %165 = math.exp %164 : vector<8x32xf32>
    %cst_37 = arith.constant 1.000000e+00 : f32
    %166 = vector.broadcast %cst_37 : f32 to vector<8x32xf32>
    %167 = arith.addf %166, %165 : vector<8x32xf32>
    %168 = arith.divf %166, %167 : vector<8x32xf32>
    %169 = vector.extract_strided_slice %156 {offsets = [0, 64], sizes = [8, 32], strides = [1, 1]} : vector<8x128xf32> to vector<8x32xf32>
    %170 = math.tanh %169 : vector<8x32xf32>
    %171 = vector.extract_strided_slice %156 {offsets = [0, 96], sizes = [8, 32], strides = [1, 1]} : vector<8x128xf32> to vector<8x32xf32>
    %172 = arith.negf %171 : vector<8x32xf32>
    %173 = math.exp %172 : vector<8x32xf32>
    %cst_38 = arith.constant 1.000000e+00 : f32
    %174 = vector.broadcast %cst_38 : f32 to vector<8x32xf32>
    %175 = arith.addf %174, %173 : vector<8x32xf32>
    %176 = arith.divf %174, %175 : vector<8x32xf32>
    %177 = arith.mulf %168, %150 : vector<8x32xf32>
    %178 = arith.mulf %162, %170 : vector<8x32xf32>
    %179 = arith.addf %177, %178 : vector<8x32xf32>
    %180 = math.tanh %179 : vector<8x32xf32>
    %181 = arith.mulf %176, %180 : vector<8x32xf32>
    %c40 = arith.constant 40 : index
    %c0_39 = arith.constant 0 : index
    %182 = vector.load %arg8[%c40, %c0_39] : memref<64x32xf32, #tpu.memory_space<vmem>>, vector<8x32xf32>
    tpu.vector_store %arg8[%c40, %c0_39], %181 {strides = array<i32>} : memref<64x32xf32, #tpu.memory_space<vmem>>, vector<8x32xf32>,
    %183 = vector.extract_strided_slice %5 {offsets = [48, 0], sizes = [8, 128], strides = [1, 1]} : vector<64x128xf32> to vector<8x128xf32>
    %cst_40 = arith.constant dense<0.000000e+00> : vector<8x128xf32>
    %184 = tpu.matmul %181, %6, %cst_40 {dimension_numbers = #tpu.dot_dimension_numbers<[1], [0], [0], [1], [0, 0, 1, 1], [], []>} : vector<8x32xf32>, vector<32x128xf32>, vector<8x128xf32> -> vector<8x128xf32>
    %185 = arith.addf %183, %184 : vector<8x128xf32>
    %186 = vector.extract_strided_slice %185 {offsets = [0, 0], sizes = [8, 32], strides = [1, 1]} : vector<8x128xf32> to vector<8x32xf32>
    %187 = arith.negf %186 : vector<8x32xf32>
    %188 = math.exp %187 : vector<8x32xf32>
    %cst_41 = arith.constant 1.000000e+00 : f32
    %189 = vector.broadcast %cst_41 : f32 to vector<8x32xf32>
    %190 = arith.addf %189, %188 : vector<8x32xf32>
    %191 = arith.divf %189, %190 : vector<8x32xf32>
    %192 = vector.extract_strided_slice %185 {offsets = [0, 32], sizes = [8, 32], strides = [1, 1]} : vector<8x128xf32> to vector<8x32xf32>
    %193 = arith.negf %192 : vector<8x32xf32>
    %194 = math.exp %193 : vector<8x32xf32>
    %cst_42 = arith.constant 1.000000e+00 : f32
    %195 = vector.broadcast %cst_42 : f32 to vector<8x32xf32>
    %196 = arith.addf %195, %194 : vector<8x32xf32>
    %197 = arith.divf %195, %196 : vector<8x32xf32>
    %198 = vector.extract_strided_slice %185 {offsets = [0, 64], sizes = [8, 32], strides = [1, 1]} : vector<8x128xf32> to vector<8x32xf32>
    %199 = math.tanh %198 : vector<8x32xf32>
    %200 = vector.extract_strided_slice %185 {offsets = [0, 96], sizes = [8, 32], strides = [1, 1]} : vector<8x128xf32> to vector<8x32xf32>
    %201 = arith.negf %200 : vector<8x32xf32>
    %202 = math.exp %201 : vector<8x32xf32>
    %cst_43 = arith.constant 1.000000e+00 : f32
    %203 = vector.broadcast %cst_43 : f32 to vector<8x32xf32>
    %204 = arith.addf %203, %202 : vector<8x32xf32>
    %205 = arith.divf %203, %204 : vector<8x32xf32>
    %206 = arith.mulf %197, %179 : vector<8x32xf32>
    %207 = arith.mulf %191, %199 : vector<8x32xf32>
    %208 = arith.addf %206, %207 : vector<8x32xf32>
    %209 = math.tanh %208 : vector<8x32xf32>
    %210 = arith.mulf %205, %209 : vector<8x32xf32>
    %c48 = arith.constant 48 : index
    %c0_44 = arith.constant 0 : index
    %211 = vector.load %arg8[%c48, %c0_44] : memref<64x32xf32, #tpu.memory_space<vmem>>, vector<8x32xf32>
    tpu.vector_store %arg8[%c48, %c0_44], %210 {strides = array<i32>} : memref<64x32xf32, #tpu.memory_space<vmem>>, vector<8x32xf32>,
    %212 = vector.extract_strided_slice %5 {offsets = [56, 0], sizes = [8, 128], strides = [1, 1]} : vector<64x128xf32> to vector<8x128xf32>
    %cst_45 = arith.constant dense<0.000000e+00> : vector<8x128xf32>
    %213 = tpu.matmul %210, %6, %cst_45 {dimension_numbers = #tpu.dot_dimension_numbers<[1], [0], [0], [1], [0, 0, 1, 1], [], []>} : vector<8x32xf32>, vector<32x128xf32>, vector<8x128xf32> -> vector<8x128xf32>
    %214 = arith.addf %212, %213 : vector<8x128xf32>
    %215 = vector.extract_strided_slice %214 {offsets = [0, 0], sizes = [8, 32], strides = [1, 1]} : vector<8x128xf32> to vector<8x32xf32>
    %216 = arith.negf %215 : vector<8x32xf32>
    %217 = math.exp %216 : vector<8x32xf32>
    %cst_46 = arith.constant 1.000000e+00 : f32
    %218 = vector.broadcast %cst_46 : f32 to vector<8x32xf32>
    %219 = arith.addf %218, %217 : vector<8x32xf32>
    %220 = arith.divf %218, %219 : vector<8x32xf32>
    %221 = vector.extract_strided_slice %214 {offsets = [0, 32], sizes = [8, 32], strides = [1, 1]} : vector<8x128xf32> to vector<8x32xf32>
    %222 = arith.negf %221 : vector<8x32xf32>
    %223 = math.exp %222 : vector<8x32xf32>
    %cst_47 = arith.constant 1.000000e+00 : f32
    %224 = vector.broadcast %cst_47 : f32 to vector<8x32xf32>
    %225 = arith.addf %224, %223 : vector<8x32xf32>
    %226 = arith.divf %224, %225 : vector<8x32xf32>
    %227 = vector.extract_strided_slice %214 {offsets = [0, 64], sizes = [8, 32], strides = [1, 1]} : vector<8x128xf32> to vector<8x32xf32>
    %228 = math.tanh %227 : vector<8x32xf32>
    %229 = vector.extract_strided_slice %214 {offsets = [0, 96], sizes = [8, 32], strides = [1, 1]} : vector<8x128xf32> to vector<8x32xf32>
    %230 = arith.negf %229 : vector<8x32xf32>
    %231 = math.exp %230 : vector<8x32xf32>
    %cst_48 = arith.constant 1.000000e+00 : f32
    %232 = vector.broadcast %cst_48 : f32 to vector<8x32xf32>
    %233 = arith.addf %232, %231 : vector<8x32xf32>
    %234 = arith.divf %232, %233 : vector<8x32xf32>
    %235 = arith.mulf %226, %208 : vector<8x32xf32>
    %236 = arith.mulf %220, %228 : vector<8x32xf32>
    %237 = arith.addf %235, %236 : vector<8x32xf32>
    %238 = math.tanh %237 : vector<8x32xf32>
    %239 = arith.mulf %234, %238 : vector<8x32xf32>
    %c56 = arith.constant 56 : index
    %c0_49 = arith.constant 0 : index
    %240 = vector.load %arg8[%c56, %c0_49] : memref<64x32xf32, #tpu.memory_space<vmem>>, vector<8x32xf32>
    tpu.vector_store %arg8[%c56, %c0_49], %239 {strides = array<i32>} : memref<64x32xf32, #tpu.memory_space<vmem>>, vector<8x32xf32>,
    %c0_50 = arith.constant 0 : index
    %c0_51 = arith.constant 0 : index
    %c0_52 = arith.constant 0 : index
    %241 = vector.load %arg9[%c0_50, %c0_51, %c0_52] : memref<2x8x32xf32, #tpu.memory_space<vmem>>, vector<1x8x32xf32>
    %242 = vector.shape_cast %241 : vector<1x8x32xf32> to vector<8x32xf32>
    %243 = vector.shape_cast %239 : vector<8x32xf32> to vector<1x8x32xf32>
    tpu.vector_store %arg9[%c0_50, %c0_51, %c0_52], %243 {strides = array<i32>} : memref<2x8x32xf32, #tpu.memory_space<vmem>>, vector<1x8x32xf32>,
    %c0_53 = arith.constant 0 : index
    %c0_54 = arith.constant 0 : index
    %c0_55 = arith.constant 0 : index
    %244 = vector.load %arg10[%c0_53, %c0_54, %c0_55] : memref<2x8x32xf32, #tpu.memory_space<vmem>>, vector<1x8x32xf32>
    %245 = vector.shape_cast %244 : vector<1x8x32xf32> to vector<8x32xf32>
    %246 = vector.shape_cast %237 : vector<8x32xf32> to vector<1x8x32xf32>
    tpu.vector_store %arg10[%c0_53, %c0_54, %c0_55], %246 {strides = array<i32>} : memref<2x8x32xf32, #tpu.memory_space<vmem>>, vector<1x8x32xf32>,
    %c0_56 = arith.constant 0 : index
    %c0_57 = arith.constant 0 : index
    %247 = vector.load %arg8[%c0_56, %c0_57] : memref<64x32xf32, #tpu.memory_space<vmem>>, vector<64x32xf32>
    %c0_58 = arith.constant 0 : index
    %c0_59 = arith.constant 0 : index
    %248 = vector.load %arg5[%c0_58, %c0_59] : memref<32x128xf32, #tpu.memory_space<vmem>>, vector<32x128xf32>
    %cst_60 = arith.constant dense<0.000000e+00> : vector<64x128xf32>
    %249 = tpu.matmul %247, %248, %cst_60 {dimension_numbers = #tpu.dot_dimension_numbers<[1], [0], [0], [1], [0, 0, 1, 1], [], []>} : vector<64x32xf32>, vector<32x128xf32>, vector<64x128xf32> -> vector<64x128xf32>
    %c0_61 = arith.constant 0 : index
    %c0_62 = arith.constant 0 : index
    %250 = vector.load %arg7[%c0_61, %c0_62] : memref<1x128xf32, #tpu.memory_space<vmem>>, vector<1x128xf32>
    %251 = vector.broadcast %250 : vector<1x128xf32> to vector<64x128xf32>
    %252 = arith.addf %249, %251 : vector<64x128xf32>
    %c0_63 = arith.constant 0 : index
    %c0_64 = arith.constant 0 : index
    %253 = vector.load %arg6[%c0_63, %c0_64] : memref<32x128xf32, #tpu.memory_space<vmem>>, vector<32x128xf32>
    %cst_65 = arith.constant 0.000000e+00 : f32
    %254 = vector.broadcast %cst_65 : f32 to vector<8x32xf32>
    %cst_66 = arith.constant 0.000000e+00 : f32
    %255 = vector.broadcast %cst_66 : f32 to vector<8x32xf32>
    %256 = vector.extract_strided_slice %252 {offsets = [0, 0], sizes = [8, 128], strides = [1, 1]} : vector<64x128xf32> to vector<8x128xf32>
    %cst_67 = arith.constant dense<0.000000e+00> : vector<8x128xf32>
    %257 = tpu.matmul %254, %253, %cst_67 {dimension_numbers = #tpu.dot_dimension_numbers<[1], [0], [0], [1], [0, 0, 1, 1], [], []>} : vector<8x32xf32>, vector<32x128xf32>, vector<8x128xf32> -> vector<8x128xf32>
    %258 = arith.addf %256, %257 : vector<8x128xf32>
    %259 = vector.extract_strided_slice %258 {offsets = [0, 0], sizes = [8, 32], strides = [1, 1]} : vector<8x128xf32> to vector<8x32xf32>
    %260 = arith.negf %259 : vector<8x32xf32>
    %261 = math.exp %260 : vector<8x32xf32>
    %cst_68 = arith.constant 1.000000e+00 : f32
    %262 = vector.broadcast %cst_68 : f32 to vector<8x32xf32>
    %263 = arith.addf %262, %261 : vector<8x32xf32>
    %264 = arith.divf %262, %263 : vector<8x32xf32>
    %265 = vector.extract_strided_slice %258 {offsets = [0, 32], sizes = [8, 32], strides = [1, 1]} : vector<8x128xf32> to vector<8x32xf32>
    %266 = arith.negf %265 : vector<8x32xf32>
    %267 = math.exp %266 : vector<8x32xf32>
    %cst_69 = arith.constant 1.000000e+00 : f32
    %268 = vector.broadcast %cst_69 : f32 to vector<8x32xf32>
    %269 = arith.addf %268, %267 : vector<8x32xf32>
    %270 = arith.divf %268, %269 : vector<8x32xf32>
    %271 = vector.extract_strided_slice %258 {offsets = [0, 64], sizes = [8, 32], strides = [1, 1]} : vector<8x128xf32> to vector<8x32xf32>
    %272 = math.tanh %271 : vector<8x32xf32>
    %273 = vector.extract_strided_slice %258 {offsets = [0, 96], sizes = [8, 32], strides = [1, 1]} : vector<8x128xf32> to vector<8x32xf32>
    %274 = arith.negf %273 : vector<8x32xf32>
    %275 = math.exp %274 : vector<8x32xf32>
    %cst_70 = arith.constant 1.000000e+00 : f32
    %276 = vector.broadcast %cst_70 : f32 to vector<8x32xf32>
    %277 = arith.addf %276, %275 : vector<8x32xf32>
    %278 = arith.divf %276, %277 : vector<8x32xf32>
    %279 = arith.mulf %270, %255 : vector<8x32xf32>
    %280 = arith.mulf %264, %272 : vector<8x32xf32>
    %281 = arith.addf %279, %280 : vector<8x32xf32>
    %282 = math.tanh %281 : vector<8x32xf32>
    %283 = arith.mulf %278, %282 : vector<8x32xf32>
    %c0_71 = arith.constant 0 : index
    %c0_72 = arith.constant 0 : index
    %284 = vector.load %arg8[%c0_71, %c0_72] : memref<64x32xf32, #tpu.memory_space<vmem>>, vector<8x32xf32>
    tpu.vector_store %arg8[%c0_71, %c0_72], %283 {strides = array<i32>} : memref<64x32xf32, #tpu.memory_space<vmem>>, vector<8x32xf32>,
    %285 = vector.extract_strided_slice %252 {offsets = [8, 0], sizes = [8, 128], strides = [1, 1]} : vector<64x128xf32> to vector<8x128xf32>
    %cst_73 = arith.constant dense<0.000000e+00> : vector<8x128xf32>
    %286 = tpu.matmul %283, %253, %cst_73 {dimension_numbers = #tpu.dot_dimension_numbers<[1], [0], [0], [1], [0, 0, 1, 1], [], []>} : vector<8x32xf32>, vector<32x128xf32>, vector<8x128xf32> -> vector<8x128xf32>
    %287 = arith.addf %285, %286 : vector<8x128xf32>
    %288 = vector.extract_strided_slice %287 {offsets = [0, 0], sizes = [8, 32], strides = [1, 1]} : vector<8x128xf32> to vector<8x32xf32>
    %289 = arith.negf %288 : vector<8x32xf32>
    %290 = math.exp %289 : vector<8x32xf32>
    %cst_74 = arith.constant 1.000000e+00 : f32
    %291 = vector.broadcast %cst_74 : f32 to vector<8x32xf32>
    %292 = arith.addf %291, %290 : vector<8x32xf32>
    %293 = arith.divf %291, %292 : vector<8x32xf32>
    %294 = vector.extract_strided_slice %287 {offsets = [0, 32], sizes = [8, 32], strides = [1, 1]} : vector<8x128xf32> to vector<8x32xf32>
    %295 = arith.negf %294 : vector<8x32xf32>
    %296 = math.exp %295 : vector<8x32xf32>
    %cst_75 = arith.constant 1.000000e+00 : f32
    %297 = vector.broadcast %cst_75 : f32 to vector<8x32xf32>
    %298 = arith.addf %297, %296 : vector<8x32xf32>
    %299 = arith.divf %297, %298 : vector<8x32xf32>
    %300 = vector.extract_strided_slice %287 {offsets = [0, 64], sizes = [8, 32], strides = [1, 1]} : vector<8x128xf32> to vector<8x32xf32>
    %301 = math.tanh %300 : vector<8x32xf32>
    %302 = vector.extract_strided_slice %287 {offsets = [0, 96], sizes = [8, 32], strides = [1, 1]} : vector<8x128xf32> to vector<8x32xf32>
    %303 = arith.negf %302 : vector<8x32xf32>
    %304 = math.exp %303 : vector<8x32xf32>
    %cst_76 = arith.constant 1.000000e+00 : f32
    %305 = vector.broadcast %cst_76 : f32 to vector<8x32xf32>
    %306 = arith.addf %305, %304 : vector<8x32xf32>
    %307 = arith.divf %305, %306 : vector<8x32xf32>
    %308 = arith.mulf %299, %281 : vector<8x32xf32>
    %309 = arith.mulf %293, %301 : vector<8x32xf32>
    %310 = arith.addf %308, %309 : vector<8x32xf32>
    %311 = math.tanh %310 : vector<8x32xf32>
    %312 = arith.mulf %307, %311 : vector<8x32xf32>
    %c8_77 = arith.constant 8 : index
    %c0_78 = arith.constant 0 : index
    %313 = vector.load %arg8[%c8_77, %c0_78] : memref<64x32xf32, #tpu.memory_space<vmem>>, vector<8x32xf32>
    tpu.vector_store %arg8[%c8_77, %c0_78], %312 {strides = array<i32>} : memref<64x32xf32, #tpu.memory_space<vmem>>, vector<8x32xf32>,
    %314 = vector.extract_strided_slice %252 {offsets = [16, 0], sizes = [8, 128], strides = [1, 1]} : vector<64x128xf32> to vector<8x128xf32>
    %cst_79 = arith.constant dense<0.000000e+00> : vector<8x128xf32>
    %315 = tpu.matmul %312, %253, %cst_79 {dimension_numbers = #tpu.dot_dimension_numbers<[1], [0], [0], [1], [0, 0, 1, 1], [], []>} : vector<8x32xf32>, vector<32x128xf32>, vector<8x128xf32> -> vector<8x128xf32>
    %316 = arith.addf %314, %315 : vector<8x128xf32>
    %317 = vector.extract_strided_slice %316 {offsets = [0, 0], sizes = [8, 32], strides = [1, 1]} : vector<8x128xf32> to vector<8x32xf32>
    %318 = arith.negf %317 : vector<8x32xf32>
    %319 = math.exp %318 : vector<8x32xf32>
    %cst_80 = arith.constant 1.000000e+00 : f32
    %320 = vector.broadcast %cst_80 : f32 to vector<8x32xf32>
    %321 = arith.addf %320, %319 : vector<8x32xf32>
    %322 = arith.divf %320, %321 : vector<8x32xf32>
    %323 = vector.extract_strided_slice %316 {offsets = [0, 32], sizes = [8, 32], strides = [1, 1]} : vector<8x128xf32> to vector<8x32xf32>
    %324 = arith.negf %323 : vector<8x32xf32>
    %325 = math.exp %324 : vector<8x32xf32>
    %cst_81 = arith.constant 1.000000e+00 : f32
    %326 = vector.broadcast %cst_81 : f32 to vector<8x32xf32>
    %327 = arith.addf %326, %325 : vector<8x32xf32>
    %328 = arith.divf %326, %327 : vector<8x32xf32>
    %329 = vector.extract_strided_slice %316 {offsets = [0, 64], sizes = [8, 32], strides = [1, 1]} : vector<8x128xf32> to vector<8x32xf32>
    %330 = math.tanh %329 : vector<8x32xf32>
    %331 = vector.extract_strided_slice %316 {offsets = [0, 96], sizes = [8, 32], strides = [1, 1]} : vector<8x128xf32> to vector<8x32xf32>
    %332 = arith.negf %331 : vector<8x32xf32>
    %333 = math.exp %332 : vector<8x32xf32>
    %cst_82 = arith.constant 1.000000e+00 : f32
    %334 = vector.broadcast %cst_82 : f32 to vector<8x32xf32>
    %335 = arith.addf %334, %333 : vector<8x32xf32>
    %336 = arith.divf %334, %335 : vector<8x32xf32>
    %337 = arith.mulf %328, %310 : vector<8x32xf32>
    %338 = arith.mulf %322, %330 : vector<8x32xf32>
    %339 = arith.addf %337, %338 : vector<8x32xf32>
    %340 = math.tanh %339 : vector<8x32xf32>
    %341 = arith.mulf %336, %340 : vector<8x32xf32>
    %c16_83 = arith.constant 16 : index
    %c0_84 = arith.constant 0 : index
    %342 = vector.load %arg8[%c16_83, %c0_84] : memref<64x32xf32, #tpu.memory_space<vmem>>, vector<8x32xf32>
    tpu.vector_store %arg8[%c16_83, %c0_84], %341 {strides = array<i32>} : memref<64x32xf32, #tpu.memory_space<vmem>>, vector<8x32xf32>,
    %343 = vector.extract_strided_slice %252 {offsets = [24, 0], sizes = [8, 128], strides = [1, 1]} : vector<64x128xf32> to vector<8x128xf32>
    %cst_85 = arith.constant dense<0.000000e+00> : vector<8x128xf32>
    %344 = tpu.matmul %341, %253, %cst_85 {dimension_numbers = #tpu.dot_dimension_numbers<[1], [0], [0], [1], [0, 0, 1, 1], [], []>} : vector<8x32xf32>, vector<32x128xf32>, vector<8x128xf32> -> vector<8x128xf32>
    %345 = arith.addf %343, %344 : vector<8x128xf32>
    %346 = vector.extract_strided_slice %345 {offsets = [0, 0], sizes = [8, 32], strides = [1, 1]} : vector<8x128xf32> to vector<8x32xf32>
    %347 = arith.negf %346 : vector<8x32xf32>
    %348 = math.exp %347 : vector<8x32xf32>
    %cst_86 = arith.constant 1.000000e+00 : f32
    %349 = vector.broadcast %cst_86 : f32 to vector<8x32xf32>
    %350 = arith.addf %349, %348 : vector<8x32xf32>
    %351 = arith.divf %349, %350 : vector<8x32xf32>
    %352 = vector.extract_strided_slice %345 {offsets = [0, 32], sizes = [8, 32], strides = [1, 1]} : vector<8x128xf32> to vector<8x32xf32>
    %353 = arith.negf %352 : vector<8x32xf32>
    %354 = math.exp %353 : vector<8x32xf32>
    %cst_87 = arith.constant 1.000000e+00 : f32
    %355 = vector.broadcast %cst_87 : f32 to vector<8x32xf32>
    %356 = arith.addf %355, %354 : vector<8x32xf32>
    %357 = arith.divf %355, %356 : vector<8x32xf32>
    %358 = vector.extract_strided_slice %345 {offsets = [0, 64], sizes = [8, 32], strides = [1, 1]} : vector<8x128xf32> to vector<8x32xf32>
    %359 = math.tanh %358 : vector<8x32xf32>
    %360 = vector.extract_strided_slice %345 {offsets = [0, 96], sizes = [8, 32], strides = [1, 1]} : vector<8x128xf32> to vector<8x32xf32>
    %361 = arith.negf %360 : vector<8x32xf32>
    %362 = math.exp %361 : vector<8x32xf32>
    %cst_88 = arith.constant 1.000000e+00 : f32
    %363 = vector.broadcast %cst_88 : f32 to vector<8x32xf32>
    %364 = arith.addf %363, %362 : vector<8x32xf32>
    %365 = arith.divf %363, %364 : vector<8x32xf32>
    %366 = arith.mulf %357, %339 : vector<8x32xf32>
    %367 = arith.mulf %351, %359 : vector<8x32xf32>
    %368 = arith.addf %366, %367 : vector<8x32xf32>
    %369 = math.tanh %368 : vector<8x32xf32>
    %370 = arith.mulf %365, %369 : vector<8x32xf32>
    %c24_89 = arith.constant 24 : index
    %c0_90 = arith.constant 0 : index
    %371 = vector.load %arg8[%c24_89, %c0_90] : memref<64x32xf32, #tpu.memory_space<vmem>>, vector<8x32xf32>
    tpu.vector_store %arg8[%c24_89, %c0_90], %370 {strides = array<i32>} : memref<64x32xf32, #tpu.memory_space<vmem>>, vector<8x32xf32>,
    %372 = vector.extract_strided_slice %252 {offsets = [32, 0], sizes = [8, 128], strides = [1, 1]} : vector<64x128xf32> to vector<8x128xf32>
    %cst_91 = arith.constant dense<0.000000e+00> : vector<8x128xf32>
    %373 = tpu.matmul %370, %253, %cst_91 {dimension_numbers = #tpu.dot_dimension_numbers<[1], [0], [0], [1], [0, 0, 1, 1], [], []>} : vector<8x32xf32>, vector<32x128xf32>, vector<8x128xf32> -> vector<8x128xf32>
    %374 = arith.addf %372, %373 : vector<8x128xf32>
    %375 = vector.extract_strided_slice %374 {offsets = [0, 0], sizes = [8, 32], strides = [1, 1]} : vector<8x128xf32> to vector<8x32xf32>
    %376 = arith.negf %375 : vector<8x32xf32>
    %377 = math.exp %376 : vector<8x32xf32>
    %cst_92 = arith.constant 1.000000e+00 : f32
    %378 = vector.broadcast %cst_92 : f32 to vector<8x32xf32>
    %379 = arith.addf %378, %377 : vector<8x32xf32>
    %380 = arith.divf %378, %379 : vector<8x32xf32>
    %381 = vector.extract_strided_slice %374 {offsets = [0, 32], sizes = [8, 32], strides = [1, 1]} : vector<8x128xf32> to vector<8x32xf32>
    %382 = arith.negf %381 : vector<8x32xf32>
    %383 = math.exp %382 : vector<8x32xf32>
    %cst_93 = arith.constant 1.000000e+00 : f32
    %384 = vector.broadcast %cst_93 : f32 to vector<8x32xf32>
    %385 = arith.addf %384, %383 : vector<8x32xf32>
    %386 = arith.divf %384, %385 : vector<8x32xf32>
    %387 = vector.extract_strided_slice %374 {offsets = [0, 64], sizes = [8, 32], strides = [1, 1]} : vector<8x128xf32> to vector<8x32xf32>
    %388 = math.tanh %387 : vector<8x32xf32>
    %389 = vector.extract_strided_slice %374 {offsets = [0, 96], sizes = [8, 32], strides = [1, 1]} : vector<8x128xf32> to vector<8x32xf32>
    %390 = arith.negf %389 : vector<8x32xf32>
    %391 = math.exp %390 : vector<8x32xf32>
    %cst_94 = arith.constant 1.000000e+00 : f32
    %392 = vector.broadcast %cst_94 : f32 to vector<8x32xf32>
    %393 = arith.addf %392, %391 : vector<8x32xf32>
    %394 = arith.divf %392, %393 : vector<8x32xf32>
    %395 = arith.mulf %386, %368 : vector<8x32xf32>
    %396 = arith.mulf %380, %388 : vector<8x32xf32>
    %397 = arith.addf %395, %396 : vector<8x32xf32>
    %398 = math.tanh %397 : vector<8x32xf32>
    %399 = arith.mulf %394, %398 : vector<8x32xf32>
    %c32_95 = arith.constant 32 : index
    %c0_96 = arith.constant 0 : index
    %400 = vector.load %arg8[%c32_95, %c0_96] : memref<64x32xf32, #tpu.memory_space<vmem>>, vector<8x32xf32>
    tpu.vector_store %arg8[%c32_95, %c0_96], %399 {strides = array<i32>} : memref<64x32xf32, #tpu.memory_space<vmem>>, vector<8x32xf32>,
    %401 = vector.extract_strided_slice %252 {offsets = [40, 0], sizes = [8, 128], strides = [1, 1]} : vector<64x128xf32> to vector<8x128xf32>
    %cst_97 = arith.constant dense<0.000000e+00> : vector<8x128xf32>
    %402 = tpu.matmul %399, %253, %cst_97 {dimension_numbers = #tpu.dot_dimension_numbers<[1], [0], [0], [1], [0, 0, 1, 1], [], []>} : vector<8x32xf32>, vector<32x128xf32>, vector<8x128xf32> -> vector<8x128xf32>
    %403 = arith.addf %401, %402 : vector<8x128xf32>
    %404 = vector.extract_strided_slice %403 {offsets = [0, 0], sizes = [8, 32], strides = [1, 1]} : vector<8x128xf32> to vector<8x32xf32>
    %405 = arith.negf %404 : vector<8x32xf32>
    %406 = math.exp %405 : vector<8x32xf32>
    %cst_98 = arith.constant 1.000000e+00 : f32
    %407 = vector.broadcast %cst_98 : f32 to vector<8x32xf32>
    %408 = arith.addf %407, %406 : vector<8x32xf32>
    %409 = arith.divf %407, %408 : vector<8x32xf32>
    %410 = vector.extract_strided_slice %403 {offsets = [0, 32], sizes = [8, 32], strides = [1, 1]} : vector<8x128xf32> to vector<8x32xf32>
    %411 = arith.negf %410 : vector<8x32xf32>
    %412 = math.exp %411 : vector<8x32xf32>
    %cst_99 = arith.constant 1.000000e+00 : f32
    %413 = vector.broadcast %cst_99 : f32 to vector<8x32xf32>
    %414 = arith.addf %413, %412 : vector<8x32xf32>
    %415 = arith.divf %413, %414 : vector<8x32xf32>
    %416 = vector.extract_strided_slice %403 {offsets = [0, 64], sizes = [8, 32], strides = [1, 1]} : vector<8x128xf32> to vector<8x32xf32>
    %417 = math.tanh %416 : vector<8x32xf32>
    %418 = vector.extract_strided_slice %403 {offsets = [0, 96], sizes = [8, 32], strides = [1, 1]} : vector<8x128xf32> to vector<8x32xf32>
    %419 = arith.negf %418 : vector<8x32xf32>
    %420 = math.exp %419 : vector<8x32xf32>
    %cst_100 = arith.constant 1.000000e+00 : f32
    %421 = vector.broadcast %cst_100 : f32 to vector<8x32xf32>
    %422 = arith.addf %421, %420 : vector<8x32xf32>
    %423 = arith.divf %421, %422 : vector<8x32xf32>
    %424 = arith.mulf %415, %397 : vector<8x32xf32>
    %425 = arith.mulf %409, %417 : vector<8x32xf32>
    %426 = arith.addf %424, %425 : vector<8x32xf32>
    %427 = math.tanh %426 : vector<8x32xf32>
    %428 = arith.mulf %423, %427 : vector<8x32xf32>
    %c40_101 = arith.constant 40 : index
    %c0_102 = arith.constant 0 : index
    %429 = vector.load %arg8[%c40_101, %c0_102] : memref<64x32xf32, #tpu.memory_space<vmem>>, vector<8x32xf32>
    tpu.vector_store %arg8[%c40_101, %c0_102], %428 {strides = array<i32>} : memref<64x32xf32, #tpu.memory_space<vmem>>, vector<8x32xf32>,
    %430 = vector.extract_strided_slice %252 {offsets = [48, 0], sizes = [8, 128], strides = [1, 1]} : vector<64x128xf32> to vector<8x128xf32>
    %cst_103 = arith.constant dense<0.000000e+00> : vector<8x128xf32>
    %431 = tpu.matmul %428, %253, %cst_103 {dimension_numbers = #tpu.dot_dimension_numbers<[1], [0], [0], [1], [0, 0, 1, 1], [], []>} : vector<8x32xf32>, vector<32x128xf32>, vector<8x128xf32> -> vector<8x128xf32>
    %432 = arith.addf %430, %431 : vector<8x128xf32>
    %433 = vector.extract_strided_slice %432 {offsets = [0, 0], sizes = [8, 32], strides = [1, 1]} : vector<8x128xf32> to vector<8x32xf32>
    %434 = arith.negf %433 : vector<8x32xf32>
    %435 = math.exp %434 : vector<8x32xf32>
    %cst_104 = arith.constant 1.000000e+00 : f32
    %436 = vector.broadcast %cst_104 : f32 to vector<8x32xf32>
    %437 = arith.addf %436, %435 : vector<8x32xf32>
    %438 = arith.divf %436, %437 : vector<8x32xf32>
    %439 = vector.extract_strided_slice %432 {offsets = [0, 32], sizes = [8, 32], strides = [1, 1]} : vector<8x128xf32> to vector<8x32xf32>
    %440 = arith.negf %439 : vector<8x32xf32>
    %441 = math.exp %440 : vector<8x32xf32>
    %cst_105 = arith.constant 1.000000e+00 : f32
    %442 = vector.broadcast %cst_105 : f32 to vector<8x32xf32>
    %443 = arith.addf %442, %441 : vector<8x32xf32>
    %444 = arith.divf %442, %443 : vector<8x32xf32>
    %445 = vector.extract_strided_slice %432 {offsets = [0, 64], sizes = [8, 32], strides = [1, 1]} : vector<8x128xf32> to vector<8x32xf32>
    %446 = math.tanh %445 : vector<8x32xf32>
    %447 = vector.extract_strided_slice %432 {offsets = [0, 96], sizes = [8, 32], strides = [1, 1]} : vector<8x128xf32> to vector<8x32xf32>
    %448 = arith.negf %447 : vector<8x32xf32>
    %449 = math.exp %448 : vector<8x32xf32>
    %cst_106 = arith.constant 1.000000e+00 : f32
    %450 = vector.broadcast %cst_106 : f32 to vector<8x32xf32>
    %451 = arith.addf %450, %449 : vector<8x32xf32>
    %452 = arith.divf %450, %451 : vector<8x32xf32>
    %453 = arith.mulf %444, %426 : vector<8x32xf32>
    %454 = arith.mulf %438, %446 : vector<8x32xf32>
    %455 = arith.addf %453, %454 : vector<8x32xf32>
    %456 = math.tanh %455 : vector<8x32xf32>
    %457 = arith.mulf %452, %456 : vector<8x32xf32>
    %c48_107 = arith.constant 48 : index
    %c0_108 = arith.constant 0 : index
    %458 = vector.load %arg8[%c48_107, %c0_108] : memref<64x32xf32, #tpu.memory_space<vmem>>, vector<8x32xf32>
    tpu.vector_store %arg8[%c48_107, %c0_108], %457 {strides = array<i32>} : memref<64x32xf32, #tpu.memory_space<vmem>>, vector<8x32xf32>,
    %459 = vector.extract_strided_slice %252 {offsets = [56, 0], sizes = [8, 128], strides = [1, 1]} : vector<64x128xf32> to vector<8x128xf32>
    %cst_109 = arith.constant dense<0.000000e+00> : vector<8x128xf32>
    %460 = tpu.matmul %457, %253, %cst_109 {dimension_numbers = #tpu.dot_dimension_numbers<[1], [0], [0], [1], [0, 0, 1, 1], [], []>} : vector<8x32xf32>, vector<32x128xf32>, vector<8x128xf32> -> vector<8x128xf32>
    %461 = arith.addf %459, %460 : vector<8x128xf32>
    %462 = vector.extract_strided_slice %461 {offsets = [0, 0], sizes = [8, 32], strides = [1, 1]} : vector<8x128xf32> to vector<8x32xf32>
    %463 = arith.negf %462 : vector<8x32xf32>
    %464 = math.exp %463 : vector<8x32xf32>
    %cst_110 = arith.constant 1.000000e+00 : f32
    %465 = vector.broadcast %cst_110 : f32 to vector<8x32xf32>
    %466 = arith.addf %465, %464 : vector<8x32xf32>
    %467 = arith.divf %465, %466 : vector<8x32xf32>
    %468 = vector.extract_strided_slice %461 {offsets = [0, 32], sizes = [8, 32], strides = [1, 1]} : vector<8x128xf32> to vector<8x32xf32>
    %469 = arith.negf %468 : vector<8x32xf32>
    %470 = math.exp %469 : vector<8x32xf32>
    %cst_111 = arith.constant 1.000000e+00 : f32
    %471 = vector.broadcast %cst_111 : f32 to vector<8x32xf32>
    %472 = arith.addf %471, %470 : vector<8x32xf32>
    %473 = arith.divf %471, %472 : vector<8x32xf32>
    %474 = vector.extract_strided_slice %461 {offsets = [0, 64], sizes = [8, 32], strides = [1, 1]} : vector<8x128xf32> to vector<8x32xf32>
    %475 = math.tanh %474 : vector<8x32xf32>
    %476 = vector.extract_strided_slice %461 {offsets = [0, 96], sizes = [8, 32], strides = [1, 1]} : vector<8x128xf32> to vector<8x32xf32>
    %477 = arith.negf %476 : vector<8x32xf32>
    %478 = math.exp %477 : vector<8x32xf32>
    %cst_112 = arith.constant 1.000000e+00 : f32
    %479 = vector.broadcast %cst_112 : f32 to vector<8x32xf32>
    %480 = arith.addf %479, %478 : vector<8x32xf32>
    %481 = arith.divf %479, %480 : vector<8x32xf32>
    %482 = arith.mulf %473, %455 : vector<8x32xf32>
    %483 = arith.mulf %467, %475 : vector<8x32xf32>
    %484 = arith.addf %482, %483 : vector<8x32xf32>
    %485 = math.tanh %484 : vector<8x32xf32>
    %486 = arith.mulf %481, %485 : vector<8x32xf32>
    %c56_113 = arith.constant 56 : index
    %c0_114 = arith.constant 0 : index
    %487 = vector.load %arg8[%c56_113, %c0_114] : memref<64x32xf32, #tpu.memory_space<vmem>>, vector<8x32xf32>
    tpu.vector_store %arg8[%c56_113, %c0_114], %486 {strides = array<i32>} : memref<64x32xf32, #tpu.memory_space<vmem>>, vector<8x32xf32>,
    %c1 = arith.constant 1 : index
    %c0_115 = arith.constant 0 : index
    %c0_116 = arith.constant 0 : index
    %488 = vector.load %arg9[%c1, %c0_115, %c0_116] : memref<2x8x32xf32, #tpu.memory_space<vmem>>, vector<1x8x32xf32>
    %489 = vector.shape_cast %488 : vector<1x8x32xf32> to vector<8x32xf32>
    %490 = vector.shape_cast %486 : vector<8x32xf32> to vector<1x8x32xf32>
    tpu.vector_store %arg9[%c1, %c0_115, %c0_116], %490 {strides = array<i32>} : memref<2x8x32xf32, #tpu.memory_space<vmem>>, vector<1x8x32xf32>,
    %c1_117 = arith.constant 1 : index
    %c0_118 = arith.constant 0 : index
    %c0_119 = arith.constant 0 : index
    %491 = vector.load %arg10[%c1_117, %c0_118, %c0_119] : memref<2x8x32xf32, #tpu.memory_space<vmem>>, vector<1x8x32xf32>
    %492 = vector.shape_cast %491 : vector<1x8x32xf32> to vector<8x32xf32>
    %493 = vector.shape_cast %484 : vector<8x32xf32> to vector<1x8x32xf32>
    tpu.vector_store %arg10[%c1_117, %c0_118, %c0_119], %493 {strides = array<i32>} : memref<2x8x32xf32, #tpu.memory_space<vmem>>, vector<1x8x32xf32>,
    return
  }
  func.func @transform_0(%arg0: i32) -> (i32, i32) {
    %c0_i32 = arith.constant 0 : i32
    %c0_i32_0 = arith.constant 0 : i32
    %c0_i32_1 = arith.constant 0 : i32
    return %c0_i32, %c0_i32_0 : i32, i32
  }
  func.func @transform_1(%arg0: i32) -> (i32, i32) {
    %c0_i32 = arith.constant 0 : i32
    %c0_i32_0 = arith.constant 0 : i32
    %c0_i32_1 = arith.constant 0 : i32
    return %c0_i32, %c0_i32_0 : i32, i32
  }
  func.func @transform_2(%arg0: i32) -> (i32, i32) {
    %c0_i32 = arith.constant 0 : i32
    %c0_i32_0 = arith.constant 0 : i32
    %c0_i32_1 = arith.constant 0 : i32
    return %c0_i32, %c0_i32_0 : i32, i32
  }
  func.func @transform_3(%arg0: i32) -> (i32, i32) {
    %c0_i32 = arith.constant 0 : i32
    %c0_i32_0 = arith.constant 0 : i32
    %c0_i32_1 = arith.constant 0 : i32
    return %c0_i32, %c0_i32_0 : i32, i32
  }
  func.func @transform_4(%arg0: i32) -> (i32, i32) {
    %c0_i32 = arith.constant 0 : i32
    %c0_i32_0 = arith.constant 0 : i32
    %c0_i32_1 = arith.constant 0 : i32
    return %c0_i32, %c0_i32_0 : i32, i32
  }
  func.func @transform_5(%arg0: i32) -> (i32, i32) {
    %c0_i32 = arith.constant 0 : i32
    %c0_i32_0 = arith.constant 0 : i32
    %c0_i32_1 = arith.constant 0 : i32
    return %c0_i32, %c0_i32_0 : i32, i32
  }
  func.func @transform_6(%arg0: i32) -> (i32, i32) {
    %c0_i32 = arith.constant 0 : i32
    %c0_i32_0 = arith.constant 0 : i32
    %c0_i32_1 = arith.constant 0 : i32
    return %c0_i32, %c0_i32_0 : i32, i32
  }
  func.func @transform_7(%arg0: i32) -> (i32, i32) {
    %c0_i32 = arith.constant 0 : i32
    %c0_i32_0 = arith.constant 0 : i32
    %c0_i32_1 = arith.constant 0 : i32
    return %c0_i32, %c0_i32_0 : i32, i32
  }
  func.func @transform_8(%arg0: i32) -> (i32, i32, i32) {
    %c0_i32 = arith.constant 0 : i32
    %c0_i32_0 = arith.constant 0 : i32
    %c0_i32_1 = arith.constant 0 : i32
    %c0_i32_2 = arith.constant 0 : i32
    return %c0_i32, %c0_i32_0, %c0_i32_1 : i32, i32, i32
  }
  func.func @transform_9(%arg0: i32) -> (i32, i32, i32) {
    %c0_i32 = arith.constant 0 : i32
    %c0_i32_0 = arith.constant 0 : i32
    %c0_i32_1 = arith.constant 0 : i32
    %c0_i32_2 = arith.constant 0 : i32
    return %c0_i32, %c0_i32_0, %c0_i32_1 : i32, i32, i32
  }
}

</mosaic_0001>

<bundles_post_ra>
// kernel: encoder_tagging_forward.1
= control target key start
LH: loop header
LB: loop body
LE: loop exit
PB: predicated region body
PF: predicated region fallthrough
CT: control target
= control target key end

     0   :  { %vm45_vm0 = vcmask 261120   ;;  %v1448_v9 = vmov 0.0   ;;  %s1449_s27 = smov 64   ;;  %s1450_s28 = smov 32   ;;  %s1899_s1 = inlined_call_operand.vmem [shape: f32[32,128], index: 1, kind: input, shape index: {}]   ;;  %s1900_s2 = inlined_call_operand.vmem [shape: f32[32,128], index: 2, kind: input, shape index: {}]   ;;  %s1901_s0 = inlined_call_operand.vmem [shape: f32[64,32], index: 0, kind: input, shape index: {}]   ;;  %s1902_s3 = inlined_call_operand.vmem [shape: f32[1,128], index: 3, kind: input, shape index: {}]   ;;  %s1903_s4 = inlined_call_operand.vmem [shape: f32[32,128], index: 4, kind: input, shape index: {}]   ;;  %s1904_s7 = inlined_call_operand.vmem [shape: f32[64,32], index: 7, kind: output, shape index: {0}]   ;;  %s1905_s6 = inlined_call_operand.vmem [shape: f32[1,128], index: 6, kind: input, shape index: {}]   ;;  %s1906_s5 = inlined_call_operand.vmem [shape: f32[32,128], index: 5, kind: input, shape index: {}]   ;;  %s1907_s8 = inlined_call_operand.vmem [shape: f32[2,8,32], index: 8, kind: output, shape index: {1}]   ;;  %s1908_s9 = inlined_call_operand.vmem [shape: f32[2,8,32], index: 9, kind: output, shape index: {2}]  }
   0x1   :  { %v40_v0 = vld [vmem:[%s1899_s1 + $0x18] sm:$0xff]  ;;  %v39_v1 = vld [vmem:[%s1899_s1 + $0x10] sm:$0xff]  ;;  %v38_v4 = vld [vmem:[%s1899_s1 + $0x8] sm:$0xff]  ;;  %s1451_s18 = smov 96  }
   0x2   :  { %v1511_v2 = vld [vmem:[%s1900_s2 + $0x18] sm:$0xff]  ;;  %82 = vmatpush.msra.mxu0 %v40_v0  ;;  %v1517_v3 = vld [vmem:[%s1900_s2 + $0x10] sm:$0xff]  ;;  %v1525_v5 = vld [vmem:[%s1900_s2 + $0x8] sm:$0xff] }
   0x3   :  { %130 = vmatpush.msra.mxu1 %v1511_v2  ;;  %195 = vmatpush.msra.mxu2 %v1511_v2  ;;  %v37_v6 = vld [vmem:[%s1899_s1] sm:$0xff]  ;;  %v653_v37 = vld [vmem:[%s1903_s4 + $0x18] sm:$0xff]  ;;  %v652_v38 = vld [vmem:[%s1903_s4 + $0x10] sm:$0xff] }
   0x4   :  { %83 = vmatpush.msra.mxu0 %v39_v1  ;;  %v1535_v7 = vld [vmem:[%s1900_s2] sm:$0xff]  ;;  %v30_v39 = vld [vmem:[%s1901_s0 + $0x8] sm:$0xff]  ;;  %694 = vmatpush.msra.mxu3 %v653_v37 }
   0x5   :  { %131 = vmatpush.msra.mxu1 %v1517_v3  ;;  %196 = vmatpush.msra.mxu2 %v1517_v3  ;;  %v29_v8 = vld [vmem:[%s1901_s0] sm:$0xff]  ;;  %v651_v40 = vld [vmem:[%s1903_s4 + $0x8] sm:$0xff] }
   0x6   :  { %84 = vmatpush.msra.mxu0 %v38_v4  ;;  %v1562_v10 = vld [vmem:[%s1902_s3] ss:$0 sm:$0xff]  ;;  %695 = vmatpush.msra.mxu3 %v652_v38 }
   0x7   :  { %132 = vmatpush.msra.mxu1 %v1525_v5  ;;  %197 = vmatpush.msra.mxu2 %v1525_v5  ;;  %v650_v41 = vld [vmem:[%s1903_s4] sm:$0xff] }
   0x8   :  { %85 = vmatpush.msra.mxu0 %v37_v6  ;;  %696 = vmatpush.msra.mxu3 %v651_v40 }
   0x9   :  { %133 = vmatpush.msra.mxu1 %v1535_v7  ;;  %1265 = vmatmul.msk.f32.vlgmr.msra.gmra.mxu0 %vm45_vm0, %v29_v8  ;;  %v31_v8 = vld [vmem:[%s1901_s0 + $0x10] sm:$0xff] }
   0xa   :  { %134 = vmatmul.f32.vlgmr.msra.gmra.mxu1 %v1448_v9  ;;  %198 = vmatpush.msra.mxu2 %v1535_v7 }
   0xb   :  { %260 = vmatpush.msrb.mxu1 %v1511_v2  ;;  %697 = vmatpush.msra.mxu3 %v650_v41 }
   0xc   :  { %390 = vmatpush.msrb.mxu2 %v1511_v2 }
   0xd   :  { %261 = vmatpush.msrb.mxu1 %v1517_v3 }
   0xe   :  { %391 = vmatpush.msrb.mxu2 %v1517_v3 }
   0xf   :  { %262 = vmatpush.msrb.mxu1 %v1525_v5 }
  0x10   :  { %392 = vmatpush.msrb.mxu2 %v1525_v5 }
  0x11   :  { %263 = vmatpush.msrb.mxu1 %v1535_v7  ;;  %1266 = vmatmul.msk.f32.gmra.mxu0 %vm45_vm0, %v30_v39  ;;  %v32_v39 = vld [vmem:[%s1901_s0 + $0x18] sm:$0xff] }
  0x12   :  { %393 = vmatpush.msrb.mxu2 %v1535_v7 }
  0x13   :  { %325 = vmatpush.msra.mxu1 %v1511_v2 }
  0x15   :  { %326 = vmatpush.msra.mxu1 %v1517_v3 }
  0x17   :  { %327 = vmatpush.msra.mxu1 %v1525_v5 }
  0x19   :  { %328 = vmatpush.msra.mxu1 %v1535_v7  ;;  %1267 = vmatmul.msk.f32.gmra.mxu0 %vm45_vm0, %v31_v8 }
  0x21   :  { %1268 = vmatmul.msk.f32.gmra.mxu0 %vm45_vm0, %v32_v39 }
  0x86   :  { %v87_v11 = vpop.f32.mrf.mxu0 }
  0x87   :  { %v135_v12 = vpop.f32.mrf.mxu1  ;;  %v88_v13 = vadd.f32 %v1562_v10, %v87_v11 }
  0x89   :  { %v138_v14 = vadd.f32 %v135_v12, %v88_v13 }
  0x8b   :  { %1319 = vtanh.f32 %v138_v14  ;;  %v1273_v16 = vmul.f32 -1.442695, %v138_v14 }
  0x8d   :  { %1321 = vpow2.f32 %v1273_v16 }
  0x8e   :  { %v90_v44 = vpop.f32.mrf.mxu0 }
  0x8f   :  { %v91_v45 = vadd.f32 %v1562_v10, %v90_v44 }
  0x91   :  { %v1320_v15 = vpop.eup %1319 }
  0x92   :  { %161 = vrot.lane.b32.xlu0 %v1320_v15, %s1449_s27 }
  0x93   :  { %v1322_v17 = vpop.eup %1321 }
  0x94   :  { %v142_v18 = vadd.f32 1.0, %v1322_v17 }
  0x96   :  { %1323 = vrcp.f32 %v142_v18  ;;  %v154_v24 = vand.u32 2147483648, %v142_v18  ;;  %vm148_vm2 = vweird.f32 %v142_v18  ;;  %v152_v25 = vand.u32 2147483647, %v142_v18  ;;  %v93_v15 = vpop.f32.mrf.mxu0 }
  0x97   :  { %v94_v16 = vadd.f32 %v1562_v10, %v93_v15 }
  0x98   :  { %v155_v27 = vor.u32 1.1754944e-38, %v154_v24  ;;  %vm153_vm4 = vcmp.eq.f32.partialorder %v152_v25, 8.507059e+37 }
  0x9c   :  { %v1324_v19 = vpop.eup %1323 }
  0x9d   :  { %v144_v20 = vmul.f32 %v1324_v19, %v142_v18  ;;  %vm149_vm1 = vweird.f32 %v1324_v19 }
  0x9e   :  { %vm150_vm3 = vmor %vm148_vm2, %vm149_vm1  ;;  %v96_v44 = vpop.f32.mrf.mxu0 }
  0x9f   :  { %v145_v21 = vsub.f32 1.0, %v144_v20 }
  0xa1   :  { %v146_v22 = vmul.f32 %v1324_v19, %v145_v21 }
  0xa3   :  { %v147_v23 = vadd.f32 %v1324_v19, %v146_v22 }
  0xa5   :  { %v151_v26 = vsel %vm150_vm3, %v1324_v19, %v147_v23 }
  0xa6   :  { %v156_v29 = vsel %vm153_vm4, %v155_v27, %v151_v26 }
  0xa7   :  { %v159_v31 = vmul.f32 0.0, %v156_v29 }
 0x104   :  { %v162_v28 = vpop.permute.xlu0 %161 }
 0x105   :  { %v164_v30 = vmul.f32 %v162_v28, %v156_v29 }
 0x107   :  { %166 = vrot.lane.b32.xlu0 %v164_v30, %s1450_s28 }
 0x179   :  { %v167_v32 = vpop.permute.xlu0 %166 }
 0x17a   :  { %v169_v33 = vadd.f32 %v167_v32, %v159_v31 }
 0x17c   :  { %1325 = vtanh.f32 %v169_v33 }
 0x182   :  { %v1326_v34 = vpop.eup %1325 }
 0x183   :  { %172 = vrot.lane.b32.xlu1 %v1326_v34, %s1449_s27 }
 0x1f5   :  { %v173_v35 = vpop.permute.xlu1 %172 }
 0x1f6   :  { %v175_v36 = vmul.f32 %v173_v35, %v156_v29 }
 0x1f8   :  { %177 = vrot.lane.b32.xlu1 %v175_v36, %s1450_s28 }
 0x26a   :  { %v178_v42 = vpop.permute.xlu1 %177 }
 0x26b   :  { %180 = vst.msk [vmem:[%s1904_s7] sm:$0xff] %vm45_vm0, %v178_v42  ;;  %1274 = vmatmul.msk.f32.vlgmr.msra.gmra.mxu2 %vm45_vm0, %v178_v42 }
 0x26c   :  { %455 = vmatpush.msra.mxu2 %v1511_v2 }
 0x26e   :  { %456 = vmatpush.msra.mxu2 %v1517_v3 }
 0x270   :  { %457 = vmatpush.msra.mxu2 %v1525_v5 }
 0x272   :  { %v642_v43 = vld [vmem:[%s1904_s7] sm:$0xff]  ;;  %458 = vmatpush.msra.mxu2 %v1535_v7 }
 0x273   :  { %1288 = vmatmul.msk.f32.vlgmr.msra.gmra.mxu3 %vm45_vm0, %v642_v43 }
 0x2ee   :  { %v200_v46 = vpop.f32.mrf.mxu2 }
 0x2ef   :  { %v203_v47 = vadd.f32 %v200_v46, %v91_v45  ;;  %v97_v45 = vadd.f32 %v1562_v10, %v96_v44 }
 0x2f1   :  { %1327 = vtanh.f32 %v203_v47  ;;  %v1275_v49 = vmul.f32 -1.442695, %v203_v47 }
 0x2f3   :  { %1329 = vpow2.f32 %v1275_v49 }
 0x2f7   :  { %v1328_v48 = vpop.eup %1327 }
 0x2f8   :  { %226 = vrot.lane.b32.xlu2 %v1328_v48, %s1449_s27 }
 0x2f9   :  { %v1330_v50 = vpop.eup %1329 }
 0x2fa   :  { %v207_v51 = vadd.f32 1.0, %v1330_v50 }
 0x2fc   :  { %1331 = vrcp.f32 %v207_v51  ;;  %v219_v57 = vand.u32 2147483648, %v207_v51  ;;  %vm213_vm6 = vweird.f32 %v207_v51  ;;  %v217_v58 = vand.u32 2147483647, %v207_v51 }
 0x2fe   :  { %v220_v60 = vor.u32 1.1754944e-38, %v219_v57  ;;  %vm218_vm8 = vcmp.eq.f32.partialorder %v217_v58, 8.507059e+37 }
 0x302   :  { %v1332_v52 = vpop.eup %1331 }
 0x303   :  { %v209_v53 = vmul.f32 %v1332_v52, %v207_v51  ;;  %vm214_vm5 = vweird.f32 %v1332_v52 }
 0x304   :  { %vm215_vm7 = vmor %vm213_vm6, %vm214_vm5 }
 0x305   :  { %v210_v54 = vsub.f32 1.0, %v209_v53 }
 0x307   :  { %v211_v55 = vmul.f32 %v1332_v52, %v210_v54 }
 0x309   :  { %v212_v56 = vadd.f32 %v1332_v52, %v211_v55 }
 0x30b   :  { %v216_v59 = vsel %vm215_vm7, %v1332_v52, %v212_v56 }
 0x30c   :  { %v221_v62 = vsel %vm218_vm8, %v220_v60, %v216_v59 }
 0x30d   :  { %v224_v0 = vmul.f32 %v221_v62, %v169_v33 }
 0x352   :  { %v227_v61 = vpop.permute.xlu2 %226 }
 0x353   :  { %v229_v63 = vmul.f32 %v227_v61, %v221_v62 }
 0x355   :  { %231 = vrot.lane.b32.xlu2 %v229_v63, %s1450_s28 }
 0x3af   :  { %v232_v1 = vpop.permute.xlu2 %231 }
 0x3b0   :  { %v234_v4 = vadd.f32 %v232_v1, %v224_v0 }
 0x3b2   :  { %1333 = vtanh.f32 %v234_v4 }
 0x3b8   :  { %v1334_v6 = vpop.eup %1333 }
 0x3b9   :  { %237 = vrot.lane.b32.xlu0 %v1334_v6, %s1449_s27 }
 0x42b   :  { %v238_v11 = vpop.permute.xlu0 %237 }
 0x42c   :  { %v240_v12 = vmul.f32 %v238_v11, %v221_v62 }
 0x42e   :  { %242 = vrot.lane.b32.xlu1 %v240_v12, %s1450_s28  ;;  %v33_v12 = vld [vmem:[%s1901_s0 + $0x20] sm:$0xff] }
 0x42f   :  { %1269 = vmatmul.msk.f32.gmra.mxu0 %vm45_vm0, %v33_v12  ;;  %v1712_v12 = vld [vmem:[%s1906_s5] sm:$0xff] }
 0x4a0   :  { %v243_v13 = vpop.permute.xlu1 %242 }
 0x4a1   :  { %245 = vst.msk [vmem:[%s1904_s7 + $0x8] sm:$0xff] %vm45_vm0, %v243_v13  ;;  %1276 = vmatmul.msk.f32.vlgmr.msrb.gmra.mxu1 %vm45_vm0, %v243_v13 }
 0x4a2   :  { %520 = vmatpush.msrb.mxu1 %v1511_v2 }
 0x4a4   :  { %521 = vmatpush.msrb.mxu1 %v1517_v3 }
 0x4a6   :  { %522 = vmatpush.msrb.mxu1 %v1525_v5 }
 0x4a8   :  { %v643_v14 = vld [vmem:[%s1904_s7 + $0x8] sm:$0xff]  ;;  %523 = vmatpush.msrb.mxu1 %v1535_v7 }
 0x4a9   :  { %1289 = vmatmul.msk.f32.gmra.mxu3 %vm45_vm0, %v643_v14 }
 0x4ac   :  { %v99_v15 = vpop.f32.mrf.mxu0 }
 0x51e   :  { %v265_v17 = vpop.f32.mrf.mxu1 }
 0x51f   :  { %v268_v18 = vadd.f32 %v265_v17, %v94_v16  ;;  %v100_v16 = vadd.f32 %v1562_v10, %v99_v15 }
 0x521   :  { %1335 = vtanh.f32 %v268_v18  ;;  %v1277_v20 = vmul.f32 -1.442695, %v268_v18 }
 0x523   :  { %1337 = vpow2.f32 %v1277_v20 }
 0x527   :  { %v1336_v19 = vpop.eup %1335 }
 0x528   :  { %291 = vrot.lane.b32.xlu2 %v1336_v19, %s1449_s27 }
 0x529   :  { %v1338_v21 = vpop.eup %1337 }
 0x52a   :  { %v272_v22 = vadd.f32 1.0, %v1338_v21 }
 0x52c   :  { %1339 = vrcp.f32 %v272_v22  ;;  %v284_v28 = vand.u32 2147483648, %v272_v22  ;;  %vm278_vm10 = vweird.f32 %v272_v22  ;;  %v282_v29 = vand.u32 2147483647, %v272_v22 }
 0x52e   :  { %v285_v31 = vor.u32 1.1754944e-38, %v284_v28  ;;  %vm283_vm12 = vcmp.eq.f32.partialorder %v282_v29, 8.507059e+37 }
 0x532   :  { %v1340_v23 = vpop.eup %1339 }
 0x533   :  { %v274_v24 = vmul.f32 %v1340_v23, %v272_v22  ;;  %vm279_vm9 = vweird.f32 %v1340_v23 }
 0x534   :  { %vm280_vm11 = vmor %vm278_vm10, %vm279_vm9 }
 0x535   :  { %v275_v25 = vsub.f32 1.0, %v274_v24 }
 0x537   :  { %v276_v26 = vmul.f32 %v1340_v23, %v275_v25 }
 0x539   :  { %v277_v27 = vadd.f32 %v1340_v23, %v276_v26 }
 0x53b   :  { %v281_v30 = vsel %vm280_vm11, %v1340_v23, %v277_v27 }
 0x53c   :  { %v286_v33 = vsel %vm283_vm12, %v285_v31, %v281_v30 }
 0x53d   :  { %v289_v35 = vmul.f32 %v286_v33, %v234_v4 }
 0x582   :  { %v292_v32 = vpop.permute.xlu2 %291 }
 0x583   :  { %v294_v34 = vmul.f32 %v292_v32, %v286_v33 }
 0x585   :  { %296 = vrot.lane.b32.xlu0 %v294_v34, %s1450_s28 }
 0x5f7   :  { %v297_v36 = vpop.permute.xlu0 %296 }
 0x5f8   :  { %v299_v37 = vadd.f32 %v297_v36, %v289_v35 }
 0x5fa   :  { %1341 = vtanh.f32 %v299_v37 }
 0x600   :  { %v1342_v38 = vpop.eup %1341 }
 0x601   :  { %302 = vrot.lane.b32.xlu1 %v1342_v38, %s1449_s27 }
 0x673   :  { %v303_v40 = vpop.permute.xlu1 %302 }
 0x674   :  { %v305_v41 = vmul.f32 %v303_v40, %v286_v33 }
 0x676   :  { %307 = vrot.lane.b32.xlu2 %v305_v41, %s1450_s28 }
 0x6d0   :  { %v308_v42 = vpop.permute.xlu2 %307 }
 0x6d1   :  { %310 = vst.msk [vmem:[%s1904_s7 + $0x10] sm:$0xff] %vm45_vm0, %v308_v42  ;;  %1278 = vmatmul.msk.f32.vlgmr.msra.gmra.mxu1 %vm45_vm0, %v308_v42 }
 0x6d8   :  { %v644_v43 = vld [vmem:[%s1904_s7 + $0x10] sm:$0xff] }
 0x6d9   :  { %1290 = vmatmul.msk.f32.gmra.mxu3 %vm45_vm0, %v644_v43 }
 0x74e   :  { %v330_v46 = vpop.f32.mrf.mxu1 }
 0x74f   :  { %v333_v47 = vadd.f32 %v330_v46, %v97_v45 }
 0x751   :  { %1343 = vtanh.f32 %v333_v47  ;;  %v1279_v49 = vmul.f32 -1.442695, %v333_v47 }
 0x753   :  { %1345 = vpow2.f32 %v1279_v49 }
 0x757   :  { %v1344_v48 = vpop.eup %1343 }
 0x758   :  { %356 = vrot.lane.b32.xlu0 %v1344_v48, %s1449_s27 }
 0x759   :  { %v1346_v50 = vpop.eup %1345 }
 0x75a   :  { %v337_v51 = vadd.f32 1.0, %v1346_v50 }
 0x75c   :  { %1347 = vrcp.f32 %v337_v51  ;;  %v349_v57 = vand.u32 2147483648, %v337_v51  ;;  %vm343_vm14 = vweird.f32 %v337_v51  ;;  %v347_v58 = vand.u32 2147483647, %v337_v51 }
 0x75e   :  { %v350_v60 = vor.u32 1.1754944e-38, %v349_v57  ;;  %vm348_vm1 = vcmp.eq.f32.partialorder %v347_v58, 8.507059e+37 }
 0x762   :  { %v1348_v52 = vpop.eup %1347 }
 0x763   :  { %v339_v53 = vmul.f32 %v1348_v52, %v337_v51  ;;  %vm344_vm13 = vweird.f32 %v1348_v52 }
 0x764   :  { %vm345_vm15 = vmor %vm343_vm14, %vm344_vm13 }
 0x765   :  { %v340_v54 = vsub.f32 1.0, %v339_v53 }
 0x767   :  { %v341_v55 = vmul.f32 %v1348_v52, %v340_v54 }
 0x769   :  { %v342_v56 = vadd.f32 %v1348_v52, %v341_v55 }
 0x76b   :  { %v346_v59 = vsel %vm345_vm15, %v1348_v52, %v342_v56 }
 0x76c   :  { %v351_v62 = vsel %vm348_vm1, %v350_v60, %v346_v59 }
 0x76d   :  { %v354_v0 = vmul.f32 %v351_v62, %v299_v37  ;;  %v34_v37 = vld [vmem:[%s1901_s0 + $0x28] sm:$0xff] }
 0x76e   :  { %1270 = vmatmul.msk.f32.gmra.mxu0 %vm45_vm0, %v34_v37 }
 0x7ca   :  { %v357_v61 = vpop.permute.xlu0 %356 }
 0x7cb   :  { %v359_v63 = vmul.f32 %v357_v61, %v351_v62 }
 0x7cd   :  { %361 = vrot.lane.b32.xlu1 %v359_v63, %s1450_s28 }
 0x7eb   :  { %v102_v40 = vpop.f32.mrf.mxu0 }
 0x7ec   :  { %v103_v41 = vadd.f32 %v1562_v10, %v102_v40 }
 0x83f   :  { %v362_v1 = vpop.permute.xlu1 %361 }
 0x840   :  { %v364_v4 = vadd.f32 %v362_v1, %v354_v0  ;;  %v35_v0 = vld [vmem:[%s1901_s0 + $0x30] sm:$0xff] }
 0x841   :  { %1271 = vmatmul.msk.f32.gmra.mxu0 %vm45_vm0, %v35_v0 }
 0x842   :  { %1349 = vtanh.f32 %v364_v4 }
 0x848   :  { %v1350_v6 = vpop.eup %1349 }
 0x849   :  { %367 = vrot.lane.b32.xlu2 %v1350_v6, %s1449_s27  ;;  %v1693_v6 = vld [vmem:[%s1906_s5 + $0x18] sm:$0xff] }
 0x84a   :  { %739 = vmatpush.msra.mxu1 %v1693_v6 }
 0x8a3   :  { %v368_v8 = vpop.permute.xlu2 %367 }
 0x8a4   :  { %v370_v11 = vmul.f32 %v368_v8, %v351_v62  ;;  %v1698_v8 = vld [vmem:[%s1906_s5 + $0x10] sm:$0xff] }
 0x8a5   :  { %740 = vmatpush.msra.mxu1 %v1698_v8 }
 0x8a6   :  { %372 = vrot.lane.b32.xlu0 %v370_v11, %s1450_s28  ;;  %v1705_v11 = vld [vmem:[%s1906_s5 + $0x8] sm:$0xff] }
 0x8a7   :  { %741 = vmatpush.msra.mxu1 %v1705_v11 }
 0x8a9   :  { %742 = vmatpush.msra.mxu1 %v1712_v12 }
 0x8be   :  { %v105_v15 = vpop.f32.mrf.mxu0 }
 0x918   :  { %v373_v13 = vpop.permute.xlu0 %372 }
 0x919   :  { %375 = vst.msk [vmem:[%s1904_s7 + $0x18] sm:$0xff] %vm45_vm0, %v373_v13  ;;  %1280 = vmatmul.msk.f32.vlgmr.msrb.gmra.mxu2 %vm45_vm0, %v373_v13 }
 0x91a   :  { %585 = vmatpush.msrb.mxu2 %v1511_v2 }
 0x91c   :  { %586 = vmatpush.msrb.mxu2 %v1517_v3 }
 0x91e   :  { %587 = vmatpush.msrb.mxu2 %v1525_v5 }
 0x920   :  { %v645_v14 = vld [vmem:[%s1904_s7 + $0x18] sm:$0xff]  ;;  %588 = vmatpush.msrb.mxu2 %v1535_v7 }
 0x921   :  { %1291 = vmatmul.msk.f32.gmra.mxu3 %vm45_vm0, %v645_v14 }
 0x99c   :  { %v395_v17 = vpop.f32.mrf.mxu2 }
 0x99d   :  { %v398_v18 = vadd.f32 %v395_v17, %v100_v16  ;;  %v106_v16 = vadd.f32 %v1562_v10, %v105_v15 }
 0x99f   :  { %1351 = vtanh.f32 %v398_v18  ;;  %v1281_v2 = vmul.f32 -1.442695, %v398_v18 }
 0x9a1   :  { %1353 = vpow2.f32 %v1281_v2 }
 0x9a5   :  { %v1352_v19 = vpop.eup %1351 }
 0x9a6   :  { %421 = vrot.lane.b32.xlu1 %v1352_v19, %s1449_s27  ;;  %v1740_v19 = vld [vmem:[%s1905_s6] ss:$0 sm:$0xff] }
 0x9a7   :  { %v1354_v3 = vpop.eup %1353 }
 0x9a8   :  { %v402_v5 = vadd.f32 1.0, %v1354_v3 }
 0x9aa   :  { %1355 = vrcp.f32 %v402_v5  ;;  %v414_v24 = vand.u32 2147483648, %v402_v5  ;;  %vm408_vm3 = vweird.f32 %v402_v5  ;;  %v412_v25 = vand.u32 2147483647, %v402_v5 }
 0x9ac   :  { %v415_v27 = vor.u32 1.1754944e-38, %v414_v24  ;;  %vm413_vm5 = vcmp.eq.f32.partialorder %v412_v25, 8.507059e+37 }
 0x9b0   :  { %v1356_v20 = vpop.eup %1355 }
 0x9b1   :  { %v404_v21 = vmul.f32 %v1356_v20, %v402_v5  ;;  %vm409_vm2 = vweird.f32 %v1356_v20 }
 0x9b2   :  { %vm410_vm4 = vmor %vm408_vm3, %vm409_vm2 }
 0x9b3   :  { %v405_v22 = vsub.f32 1.0, %v404_v21 }
 0x9b5   :  { %v406_v7 = vmul.f32 %v1356_v20, %v405_v22 }
 0x9b7   :  { %v407_v23 = vadd.f32 %v1356_v20, %v406_v7 }
 0x9b9   :  { %v411_v26 = vsel %vm410_vm4, %v1356_v20, %v407_v23 }
 0x9ba   :  { %v416_v29 = vsel %vm413_vm5, %v415_v27, %v411_v26 }
 0x9bb   :  { %v419_v31 = vmul.f32 %v416_v29, %v364_v4 }
 0xa18   :  { %v422_v28 = vpop.permute.xlu1 %421 }
 0xa19   :  { %v424_v30 = vmul.f32 %v422_v28, %v416_v29 }
 0xa1b   :  { %426 = vrot.lane.b32.xlu2 %v424_v30, %s1450_s28 }
 0xa75   :  { %v427_v32 = vpop.permute.xlu2 %426 }
 0xa76   :  { %v429_v33 = vadd.f32 %v427_v32, %v419_v31 }
 0xa78   :  { %1357 = vtanh.f32 %v429_v33 }
 0xa7e   :  { %v1358_v34 = vpop.eup %1357 }
 0xa7f   :  { %432 = vrot.lane.b32.xlu0 %v1358_v34, %s1449_s27 }
 0xaf1   :  { %v433_v35 = vpop.permute.xlu0 %432 }
 0xaf2   :  { %v435_v36 = vmul.f32 %v433_v35, %v416_v29 }
 0xaf4   :  { %437 = vrot.lane.b32.xlu1 %v435_v36, %s1450_s28 }
 0xb66   :  { %v438_v38 = vpop.permute.xlu1 %437 }
 0xb67   :  { %440 = vst.msk [vmem:[%s1904_s7 + $0x20] sm:$0xff] %vm45_vm0, %v438_v38  ;;  %1282 = vmatmul.msk.f32.vlgmr.msra.gmra.mxu2 %vm45_vm0, %v438_v38 }
 0xb68   :  { %804 = vmatpush.msra.mxu2 %v1693_v6 }
 0xb6a   :  { %805 = vmatpush.msra.mxu2 %v1698_v8 }
 0xb6c   :  { %806 = vmatpush.msra.mxu2 %v1705_v11 }
 0xb6e   :  { %v646_v39 = vld [vmem:[%s1904_s7 + $0x20] sm:$0xff]  ;;  %807 = vmatpush.msra.mxu2 %v1712_v12 }
 0xb6f   :  { %1292 = vmatmul.msk.f32.gmra.mxu3 %vm45_vm0, %v646_v39 }
 0xbea   :  { %v460_v42 = vpop.f32.mrf.mxu2 }
 0xbeb   :  { %v463_v43 = vadd.f32 %v460_v42, %v103_v41 }
 0xbed   :  { %1359 = vtanh.f32 %v463_v43  ;;  %v1283_v45 = vmul.f32 -1.442695, %v463_v43 }
 0xbef   :  { %1361 = vpow2.f32 %v1283_v45 }
 0xbf3   :  { %v1360_v44 = vpop.eup %1359 }
 0xbf4   :  { %486 = vrot.lane.b32.xlu2 %v1360_v44, %s1449_s27 }
 0xbf5   :  { %v1362_v46 = vpop.eup %1361 }
 0xbf6   :  { %v467_v47 = vadd.f32 1.0, %v1362_v46 }
 0xbf8   :  { %1363 = vrcp.f32 %v467_v47  ;;  %v479_v53 = vand.u32 2147483648, %v467_v47  ;;  %vm473_vm7 = vweird.f32 %v467_v47  ;;  %v477_v54 = vand.u32 2147483647, %v467_v47 }
 0xbfa   :  { %v480_v56 = vor.u32 1.1754944e-38, %v479_v53  ;;  %vm478_vm9 = vcmp.eq.f32.partialorder %v477_v54, 8.507059e+37 }
 0xbfe   :  { %v1364_v48 = vpop.eup %1363 }
 0xbff   :  { %v469_v49 = vmul.f32 %v1364_v48, %v467_v47  ;;  %vm474_vm6 = vweird.f32 %v1364_v48 }
 0xc00   :  { %vm475_vm8 = vmor %vm473_vm7, %vm474_vm6 }
 0xc01   :  { %v470_v50 = vsub.f32 1.0, %v469_v49 }
 0xc03   :  { %v471_v51 = vmul.f32 %v1364_v48, %v470_v50 }
 0xc05   :  { %v472_v52 = vadd.f32 %v1364_v48, %v471_v51 }
 0xc07   :  { %v476_v55 = vsel %vm475_vm8, %v1364_v48, %v472_v52 }
 0xc08   :  { %v481_v58 = vsel %vm478_vm9, %v480_v56, %v476_v55 }
 0xc09   :  { %v484_v60 = vmul.f32 %v481_v58, %v429_v33 }
 0xc4e   :  { %v487_v57 = vpop.permute.xlu2 %486 }
 0xc4f   :  { %v489_v59 = vmul.f32 %v487_v57, %v481_v58 }
 0xc51   :  { %491 = vrot.lane.b32.xlu0 %v489_v59, %s1450_s28 }
 0xcc3   :  { %v492_v61 = vpop.permute.xlu0 %491 }
 0xcc4   :  { %v1681_v62 = vadd.f32 %v492_v61, %v484_v60 }
 0xcc6   :  { %1365 = vtanh.f32 %v1681_v62 }
 0xccc   :  { %v1366_v63 = vpop.eup %1365 }
 0xccd   :  { %497 = vrot.lane.b32.xlu1 %v1366_v63, %s1449_s27 }
 0xd3f   :  { %v498_v1 = vpop.permute.xlu1 %497 }
 0xd40   :  { %v500_v4 = vmul.f32 %v498_v1, %v481_v58 }
 0xd42   :  { %502 = vrot.lane.b32.xlu2 %v500_v4, %s1450_s28 }
 0xd9c   :  { %v503_v13 = vpop.permute.xlu2 %502 }
 0xd9d   :  { %505 = vst.msk [vmem:[%s1904_s7 + $0x28] sm:$0xff] %vm45_vm0, %v503_v13  ;;  %1284 = vmatmul.msk.f32.vlgmr.msrb.gmra.mxu1 %vm45_vm0, %v503_v13 }
 0xd9e   :  { %869 = vmatpush.msrb.mxu1 %v1693_v6 }
 0xda0   :  { %870 = vmatpush.msrb.mxu1 %v1698_v8 }
 0xda2   :  { %871 = vmatpush.msrb.mxu1 %v1705_v11 }
 0xda4   :  { %v647_v14 = vld [vmem:[%s1904_s7 + $0x28] sm:$0xff]  ;;  %872 = vmatpush.msrb.mxu1 %v1712_v12 }
 0xda5   :  { %1293 = vmatmul.msk.f32.gmra.mxu3 %vm45_vm0, %v647_v14  ;;  %743 = vmatmul.f32.vlgmr.msra.gmra.mxu1 %v1448_v9  ;;  %v699_v9 = vpop.f32.mrf.mxu3 }
 0xda6   :  { %999 = vmatpush.msra.mxu1 %v1693_v6  ;;  %v700_v2 = vadd.f32 %v1740_v19, %v699_v9 }
 0xda8   :  { %1000 = vmatpush.msra.mxu1 %v1698_v8 }
 0xdaa   :  { %1001 = vmatpush.msra.mxu1 %v1705_v11 }
 0xdac   :  { %1002 = vmatpush.msra.mxu1 %v1712_v12 }
 0xdad   :  { %v702_v13 = vpop.f32.mrf.mxu3 }
 0xdae   :  { %v703_v14 = vadd.f32 %v1740_v19, %v702_v13 }
 0xe1a   :  { %v525_v17 = vpop.f32.mrf.mxu1 }
 0xe1b   :  { %v528_v18 = vadd.f32 %v525_v17, %v106_v16 }
 0xe1d   :  { %1367 = vtanh.f32 %v528_v18  ;;  %v1285_v10 = vmul.f32 -1.442695, %v528_v18 }
 0xe22   :  { %v744_v3 = vpop.f32.mrf.mxu1 }
 0xe23   :  { %v1368_v5 = vpop.eup %1367  ;;  %v747_v20 = vadd.f32 %v744_v3, %v700_v2 }
 0xe24   :  { %551 = vrot.lane.b32.xlu0 %v1368_v5, %s1449_s27 }
 0xe25   :  { %1369 = vtanh.f32 %v747_v20  ;;  %v1296_v22 = vmul.f32 -1.442695, %v747_v20 }
 0xe26   :  { %1371 = vpow2.f32 %v1285_v10 }
 0xe27   :  { %1373 = vpow2.f32 %v1296_v22 }
 0xe2b   :  { %v1370_v21 = vpop.eup %1369 }
 0xe2c   :  { %770 = vrot.lane.b32.xlu1 %v1370_v21, %s1449_s27  ;;  %v1372_v7 = vpop.eup %1371 }
 0xe2d   :  { %v532_v23 = vadd.f32 1.0, %v1372_v7  ;;  %v1374_v24 = vpop.eup %1373 }
 0xe2e   :  { %v751_v25 = vadd.f32 1.0, %v1374_v24 }
 0xe2f   :  { %1375 = vrcp.f32 %v532_v23  ;;  %v544_v34 = vand.u32 2147483648, %v532_v23  ;;  %vm538_vm11 = vweird.f32 %v532_v23  ;;  %v542_v35 = vand.u32 2147483647, %v532_v23 }
 0xe30   :  { %1377 = vrcp.f32 %v751_v25  ;;  %v763_v43 = vand.u32 2147483648, %v751_v25  ;;  %vm757_vm15 = vweird.f32 %v751_v25  ;;  %v761_v44 = vand.u32 2147483647, %v751_v25 }
 0xe31   :  { %v545_v38 = vor.u32 1.1754944e-38, %v544_v34  ;;  %vm543_vm13 = vcmp.eq.f32.partialorder %v542_v35, 8.507059e+37  ;;  %v705_v35 = vpop.f32.mrf.mxu3 }
 0xe32   :  { %v764_v46 = vor.u32 1.1754944e-38, %v763_v43  ;;  %vm762_vm2 = vcmp.eq.f32.partialorder %v761_v44, 8.507059e+37 }
 0xe35   :  { %v1376_v26 = vpop.eup %1375 }
 0xe36   :  { %v534_v27 = vmul.f32 %v1376_v26, %v532_v23  ;;  %v1378_v29 = vpop.eup %1377  ;;  %vm539_vm10 = vweird.f32 %v1376_v26 }
 0xe37   :  { %v753_v31 = vmul.f32 %v1378_v29, %v751_v25  ;;  %vm540_vm12 = vmor %vm538_vm11, %vm539_vm10  ;;  %vm758_vm14 = vweird.f32 %v1378_v29 }
 0xe38   :  { %v535_v28 = vsub.f32 1.0, %v534_v27  ;;  %vm759_vm1 = vmor %vm757_vm15, %vm758_vm14 }
 0xe39   :  { %v754_v33 = vsub.f32 1.0, %v753_v31 }
 0xe3a   :  { %v536_v30 = vmul.f32 %v1376_v26, %v535_v28 }
 0xe3b   :  { %v755_v37 = vmul.f32 %v1378_v29, %v754_v33 }
 0xe3c   :  { %v537_v32 = vadd.f32 %v1376_v26, %v536_v30 }
 0xe3d   :  { %v756_v42 = vadd.f32 %v1378_v29, %v755_v37 }
 0xe3e   :  { %v541_v36 = vsel %vm540_vm12, %v1376_v26, %v537_v32 }
 0xe3f   :  { %v546_v40 = vsel %vm543_vm13, %v545_v38, %v541_v36  ;;  %v760_v45 = vsel %vm759_vm1, %v1378_v29, %v756_v42  ;;  %v706_v36 = vadd.f32 %v1740_v19, %v705_v35 }
 0xe40   :  { %v765_v48 = vsel %vm762_vm2, %v764_v46, %v760_v45  ;;  %v549_v50 = vmul.f32 %v546_v40, %v1681_v62  ;;  %v36_v62 = vld [vmem:[%s1901_s0 + $0x38] sm:$0xff] }
 0xe41   :  { %v768_v54 = vmul.f32 0.0, %v765_v48  ;;  %1272 = vmatmul.msk.f32.gmra.mxu0 %vm45_vm0, %v36_v62 }
 0xe96   :  { %v552_v39 = vpop.permute.xlu0 %551 }
 0xe97   :  { %v554_v41 = vmul.f32 %v552_v39, %v546_v40 }
 0xe99   :  { %556 = vrot.lane.b32.xlu2 %v554_v41, %s1450_s28 }
 0xe9e   :  { %v771_v47 = vpop.permute.xlu1 %770 }
 0xe9f   :  { %v773_v49 = vmul.f32 %v771_v47, %v765_v48 }
 0xea1   :  { %775 = vrot.lane.b32.xlu0 %v773_v49, %s1450_s28 }
 0xef3   :  { %v557_v51 = vpop.permute.xlu2 %556 }
 0xef4   :  { %v1748_v52 = vadd.f32 %v557_v51, %v549_v50 }
 0xef6   :  { %1379 = vtanh.f32 %v1748_v52 }
 0xefc   :  { %v1380_v53 = vpop.eup %1379 }
 0xefd   :  { %562 = vrot.lane.b32.xlu1 %v1380_v53, %s1449_s27 }
 0xf13   :  { %v776_v55 = vpop.permute.xlu0 %775 }
 0xf14   :  { %v778_v56 = vadd.f32 %v776_v55, %v768_v54 }
 0xf16   :  { %1381 = vtanh.f32 %v778_v56 }
 0xf1c   :  { %v1382_v57 = vpop.eup %1381 }
 0xf1d   :  { %781 = vrot.lane.b32.xlu2 %v1382_v57, %s1449_s27 }
 0xf6f   :  { %v563_v58 = vpop.permute.xlu1 %562 }
 0xf70   :  { %v565_v59 = vmul.f32 %v563_v58, %v546_v40 }
 0xf72   :  { %567 = vrot.lane.b32.xlu0 %v565_v59, %s1450_s28 }
 0xf77   :  { %v782_v60 = vpop.permute.xlu2 %781 }
 0xf78   :  { %v784_v61 = vmul.f32 %v782_v60, %v765_v48 }
 0xf7a   :  { %786 = vrot.lane.b32.xlu1 %v784_v61, %s1450_s28 }
 0xfe4   :  { %v568_v63 = vpop.permute.xlu0 %567 }
 0xfe5   :  { %570 = vst.msk [vmem:[%s1904_s7 + $0x30] sm:$0xff] %vm45_vm0, %v568_v63  ;;  %1286 = vmatmul.msk.f32.vlgmr.msrb.gmra.mxu2 %vm45_vm0, %v568_v63  ;;  %v708_v63 = vpop.f32.mrf.mxu3 }
 0xfe6   :  { %934 = vmatpush.msrb.mxu2 %v1693_v6 }
 0xfe8   :  { %935 = vmatpush.msrb.mxu2 %v1698_v8 }
 0xfea   :  { %936 = vmatpush.msrb.mxu2 %v1705_v11 }
 0xfec   :  { %v787_v0 = vpop.permute.xlu1 %786  ;;  %v648_v1 = vld [vmem:[%s1904_s7 + $0x30] sm:$0xff]  ;;  %937 = vmatpush.msrb.mxu2 %v1712_v12 }
 0xfed   :  { %789 = vst.msk [vmem:[%s1904_s7] sm:$0xff] %vm45_vm0, %v787_v0  ;;  %1294 = vmatmul.msk.f32.gmra.mxu3 %vm45_vm0, %v648_v1  ;;  %1297 = vmatmul.msk.f32.vlgmr.msra.gmra.mxu2 %vm45_vm0, %v787_v0  ;;  %v709_v0 = vadd.f32 %v1740_v19, %v708_v63 }
 0xfee   :  { %1064 = vmatpush.msra.mxu2 %v1693_v6 }
 0xff0   :  { %1065 = vmatpush.msra.mxu2 %v1698_v8 }
 0xff2   :  { %1066 = vmatpush.msra.mxu2 %v1705_v11 }
 0xff4   :  { %1067 = vmatpush.msra.mxu2 %v1712_v12 }
0x1068   :  { %v1781_v4 = vpop.f32.mrf.mxu2 }
0x1070   :  { %v809_v15 = vpop.f32.mrf.mxu2 }
0x1071   :  { %v812_v16 = vadd.f32 %v809_v15, %v703_v14 }
0x1073   :  { %1383 = vtanh.f32 %v812_v16  ;;  %v1298_v18 = vmul.f32 -1.442695, %v812_v16 }
0x1075   :  { %1385 = vpow2.f32 %v1298_v18 }
0x1079   :  { %v1384_v17 = vpop.eup %1383 }
0x107a   :  { %835 = vrot.lane.b32.xlu2 %v1384_v17, %s1449_s27 }
0x107b   :  { %v1386_v9 = vpop.eup %1385 }
0x107c   :  { %v816_v2 = vadd.f32 1.0, %v1386_v9 }
0x107e   :  { %1387 = vrcp.f32 %v816_v2  ;;  %v828_v22 = vand.u32 2147483648, %v816_v2  ;;  %vm822_vm4 = vweird.f32 %v816_v2  ;;  %v826_v7 = vand.u32 2147483647, %v816_v2 }
0x1080   :  { %v829_v24 = vor.u32 1.1754944e-38, %v828_v22  ;;  %vm827_vm6 = vcmp.eq.f32.partialorder %v826_v7, 8.507059e+37 }
0x1084   :  { %v1388_v3 = vpop.eup %1387 }
0x1085   :  { %v818_v5 = vmul.f32 %v1388_v3, %v816_v2  ;;  %vm823_vm3 = vweird.f32 %v1388_v3 }
0x1086   :  { %vm824_vm5 = vmor %vm822_vm4, %vm823_vm3 }
0x1087   :  { %v819_v20 = vsub.f32 1.0, %v818_v5 }
0x1089   :  { %v820_v21 = vmul.f32 %v1388_v3, %v819_v20 }
0x108b   :  { %v821_v10 = vadd.f32 %v1388_v3, %v820_v21 }
0x108d   :  { %v825_v23 = vsel %vm824_vm5, %v1388_v3, %v821_v10 }
0x108e   :  { %v830_v26 = vsel %vm827_vm6, %v829_v24, %v825_v23 }
0x108f   :  { %v833_v28 = vmul.f32 %v830_v26, %v778_v56 }
0x10d4   :  { %v836_v25 = vpop.permute.xlu2 %835 }
0x10d5   :  { %v838_v27 = vmul.f32 %v836_v25, %v830_v26 }
0x10d7   :  { %840 = vrot.lane.b32.xlu0 %v838_v27, %s1450_s28 }
0x1149   :  { %v841_v29 = vpop.permute.xlu0 %840 }
0x114a   :  { %v843_v30 = vadd.f32 %v841_v29, %v833_v28  ;;  %v711_v28 = vpop.f32.mrf.mxu3 }
0x114b   :  { %v712_v29 = vadd.f32 %v1740_v19, %v711_v28 }
0x114c   :  { %1389 = vtanh.f32 %v843_v30 }
0x1152   :  { %v1390_v31 = vpop.eup %1389 }
0x1153   :  { %846 = vrot.lane.b32.xlu1 %v1390_v31, %s1449_s27 }
0x11c5   :  { %v847_v32 = vpop.permute.xlu1 %846 }
0x11c6   :  { %v849_v33 = vmul.f32 %v847_v32, %v830_v26 }
0x11c8   :  { %851 = vrot.lane.b32.xlu2 %v849_v33, %s1450_s28 }
0x1222   :  { %v852_v34 = vpop.permute.xlu2 %851 }
0x1223   :  { %854 = vst.msk [vmem:[%s1904_s7 + $0x8] sm:$0xff] %vm45_vm0, %v852_v34  ;;  %1299 = vmatmul.msk.f32.vlgmr.msrb.gmra.mxu1 %vm45_vm0, %v852_v34 }
0x1224   :  { %1129 = vmatpush.msrb.mxu1 %v1693_v6 }
0x1226   :  { %1130 = vmatpush.msrb.mxu1 %v1698_v8 }
0x1228   :  { %1131 = vmatpush.msrb.mxu1 %v1705_v11 }
0x122a   :  { %1132 = vmatpush.msrb.mxu1 %v1712_v12 }
0x12a0   :  { %v874_v37 = vpop.f32.mrf.mxu1 }
0x12a1   :  { %v877_v38 = vadd.f32 %v874_v37, %v706_v36 }
0x12a3   :  { %1391 = vtanh.f32 %v877_v38  ;;  %v1300_v40 = vmul.f32 -1.442695, %v877_v38 }
0x12a5   :  { %1393 = vpow2.f32 %v1300_v40 }
0x12a9   :  { %v1392_v39 = vpop.eup %1391 }
0x12aa   :  { %900 = vrot.lane.b32.xlu0 %v1392_v39, %s1449_s27 }
0x12ab   :  { %v1394_v41 = vpop.eup %1393 }
0x12ac   :  { %v881_v42 = vadd.f32 1.0, %v1394_v41 }
0x12ae   :  { %1395 = vrcp.f32 %v881_v42  ;;  %v893_v48 = vand.u32 2147483648, %v881_v42  ;;  %vm887_vm8 = vweird.f32 %v881_v42  ;;  %v891_v49 = vand.u32 2147483647, %v881_v42 }
0x12b0   :  { %v894_v51 = vor.u32 1.1754944e-38, %v893_v48  ;;  %vm892_vm10 = vcmp.eq.f32.partialorder %v891_v49, 8.507059e+37 }
0x12b4   :  { %v1396_v43 = vpop.eup %1395 }
0x12b5   :  { %v883_v44 = vmul.f32 %v1396_v43, %v881_v42  ;;  %vm888_vm7 = vweird.f32 %v1396_v43 }
0x12b6   :  { %vm889_vm9 = vmor %vm887_vm8, %vm888_vm7 }
0x12b7   :  { %v884_v45 = vsub.f32 1.0, %v883_v44 }
0x12b9   :  { %v885_v46 = vmul.f32 %v1396_v43, %v884_v45 }
0x12bb   :  { %v886_v47 = vadd.f32 %v1396_v43, %v885_v46 }
0x12bd   :  { %v890_v50 = vsel %vm889_vm9, %v1396_v43, %v886_v47 }
0x12be   :  { %v895_v54 = vsel %vm892_vm10, %v894_v51, %v890_v50 }
0x12bf   :  { %v898_v56 = vmul.f32 %v895_v54, %v843_v30 }
0x131c   :  { %v901_v53 = vpop.permute.xlu0 %900 }
0x131d   :  { %v903_v55 = vmul.f32 %v901_v53, %v895_v54 }
0x131f   :  { %905 = vrot.lane.b32.xlu1 %v903_v55, %s1450_s28 }
0x1391   :  { %v906_v57 = vpop.permute.xlu1 %905 }
0x1392   :  { %v908_v58 = vadd.f32 %v906_v57, %v898_v56  ;;  %v714_v56 = vpop.f32.mrf.mxu3 }
0x1393   :  { %v715_v57 = vadd.f32 %v1740_v19, %v714_v56 }
0x1394   :  { %1397 = vtanh.f32 %v908_v58 }
0x139a   :  { %v1398_v59 = vpop.eup %1397 }
0x139b   :  { %911 = vrot.lane.b32.xlu2 %v1398_v59, %s1449_s27 }
0x13f5   :  { %v912_v60 = vpop.permute.xlu2 %911 }
0x13f6   :  { %v914_v61 = vmul.f32 %v912_v60, %v895_v54 }
0x13f8   :  { %916 = vrot.lane.b32.xlu0 %v914_v61, %s1450_s28 }
0x146a   :  { %v917_v62 = vpop.permute.xlu0 %916 }
0x146b   :  { %919 = vst.msk [vmem:[%s1904_s7 + $0x10] sm:$0xff] %vm45_vm0, %v917_v62  ;;  %1301 = vmatmul.msk.f32.vlgmr.msrb.gmra.mxu2 %vm45_vm0, %v917_v62 }
0x146c   :  { %1194 = vmatpush.msrb.mxu2 %v1693_v6 }
0x146e   :  { %1195 = vmatpush.msrb.mxu2 %v1698_v8 }
0x1470   :  { %1196 = vmatpush.msrb.mxu2 %v1705_v11 }
0x1472   :  { %1197 = vmatpush.msrb.mxu2 %v1712_v12 }
0x14ee   :  { %v939_v1 = vpop.f32.mrf.mxu2 }
0x14ef   :  { %v942_v13 = vadd.f32 %v939_v1, %v709_v0 }
0x14f1   :  { %1399 = vtanh.f32 %v942_v13  ;;  %v1302_v15 = vmul.f32 -1.442695, %v942_v13 }
0x14f3   :  { %1401 = vpow2.f32 %v1302_v15  ;;  %v108_v15 = vpop.f32.mrf.mxu0 }
0x14f7   :  { %v1400_v14 = vpop.eup %1399 }
0x14f8   :  { %965 = vrot.lane.b32.xlu1 %v1400_v14, %s1449_s27 }
0x14f9   :  { %v1402_v16 = vpop.eup %1401 }
0x14fa   :  { %v946_v17 = vadd.f32 1.0, %v1402_v16 }
0x14fc   :  { %1403 = vrcp.f32 %v946_v17  ;;  %v958_v12 = vand.u32 2147483648, %v946_v17  ;;  %vm952_vm12 = vweird.f32 %v946_v17  ;;  %v956_v2 = vand.u32 2147483647, %v946_v17 }
0x14fe   :  { %v959_v5 = vor.u32 1.1754944e-38, %v958_v12  ;;  %vm957_vm14 = vcmp.eq.f32.partialorder %v956_v2, 8.507059e+37 }
0x1502   :  { %v1404_v6 = vpop.eup %1403 }
0x1503   :  { %v948_v8 = vmul.f32 %v1404_v6, %v946_v17  ;;  %vm953_vm11 = vweird.f32 %v1404_v6 }
0x1504   :  { %vm954_vm13 = vmor %vm952_vm12, %vm953_vm11 }
0x1505   :  { %v949_v18 = vsub.f32 1.0, %v948_v8  ;;  %v1447_v8 = vld [vmem:[%s1902_s3] ss:$0 sm:$0xff] }
0x1507   :  { %v950_v11 = vmul.f32 %v1404_v6, %v949_v18  ;;  %v109_v18 = vadd.f32 %v1447_v8, %v108_v15 }
0x1509   :  { %v951_v9 = vadd.f32 %v1404_v6, %v950_v11  ;;  %v593_v12 = vadd.f32 %v1781_v4, %v109_v18 }
0x150b   :  { %v955_v3 = vsel %vm954_vm13, %v1404_v6, %v951_v9 }
0x150c   :  { %v960_v21 = vsel %vm957_vm14, %v959_v5, %v955_v3 }
0x150d   :  { %v963_v22 = vmul.f32 %v960_v21, %v908_v58 }
0x156a   :  { %v966_v20 = vpop.permute.xlu1 %965 }
0x156b   :  { %v968_v10 = vmul.f32 %v966_v20, %v960_v21 }
0x156d   :  { %970 = vrot.lane.b32.xlu2 %v968_v10, %s1450_s28 }
0x15c7   :  { %v971_v7 = vpop.permute.xlu2 %970 }
0x15c8   :  { %v973_v23 = vadd.f32 %v971_v7, %v963_v22 }
0x15ca   :  { %1405 = vtanh.f32 %v973_v23 }
0x15d0   :  { %v1406_v24 = vpop.eup %1405 }
0x15d1   :  { %976 = vrot.lane.b32.xlu0 %v1406_v24, %s1449_s27 }
0x1643   :  { %v977_v25 = vpop.permute.xlu0 %976 }
0x1644   :  { %v979_v26 = vmul.f32 %v977_v25, %v960_v21 }
0x1646   :  { %981 = vrot.lane.b32.xlu1 %v979_v26, %s1450_s28 }
0x16b8   :  { %v982_v27 = vpop.permute.xlu1 %981 }
0x16b9   :  { %984 = vst.msk [vmem:[%s1904_s7 + $0x18] sm:$0xff] %vm45_vm0, %v982_v27  ;;  %1303 = vmatmul.msk.f32.vlgmr.msra.gmra.mxu1 %vm45_vm0, %v982_v27 }
0x1736   :  { %v1004_v30 = vpop.f32.mrf.mxu1 }
0x1737   :  { %v1007_v31 = vadd.f32 %v1004_v30, %v712_v29 }
0x1739   :  { %1407 = vtanh.f32 %v1007_v31  ;;  %v1304_v33 = vmul.f32 -1.442695, %v1007_v31 }
0x173b   :  { %1409 = vpow2.f32 %v1304_v33 }
0x173f   :  { %v1408_v32 = vpop.eup %1407 }
0x1740   :  { %1030 = vrot.lane.b32.xlu2 %v1408_v32, %s1449_s27 }
0x1741   :  { %v1410_v34 = vpop.eup %1409 }
0x1742   :  { %v1011_v35 = vadd.f32 1.0, %v1410_v34 }
0x1744   :  { %1411 = vrcp.f32 %v1011_v35  ;;  %v1023_v41 = vand.u32 2147483648, %v1011_v35  ;;  %vm1017_vm1 = vweird.f32 %v1011_v35  ;;  %v1021_v42 = vand.u32 2147483647, %v1011_v35 }
0x1746   :  { %v1024_v44 = vor.u32 1.1754944e-38, %v1023_v41  ;;  %vm1022_vm3 = vcmp.eq.f32.partialorder %v1021_v42, 8.507059e+37 }
0x174a   :  { %v1412_v36 = vpop.eup %1411 }
0x174b   :  { %v1013_v37 = vmul.f32 %v1412_v36, %v1011_v35  ;;  %vm1018_vm15 = vweird.f32 %v1412_v36 }
0x174c   :  { %vm1019_vm2 = vmor %vm1017_vm1, %vm1018_vm15 }
0x174d   :  { %v1014_v38 = vsub.f32 1.0, %v1013_v37 }
0x174f   :  { %v1015_v39 = vmul.f32 %v1412_v36, %v1014_v38 }
0x1751   :  { %v1016_v40 = vadd.f32 %v1412_v36, %v1015_v39 }
0x1753   :  { %v1020_v43 = vsel %vm1019_vm2, %v1412_v36, %v1016_v40  ;;  %v717_v40 = vpop.f32.mrf.mxu3 }
0x1754   :  { %v1025_v46 = vsel %vm1022_vm3, %v1024_v44, %v1020_v43  ;;  %v718_v41 = vadd.f32 %v1740_v19, %v717_v40 }
0x1755   :  { %v1028_v48 = vmul.f32 %v1025_v46, %v973_v23  ;;  %v1287_v23 = vmul.f32 -1.442695, %v593_v12 }
0x179a   :  { %v1031_v45 = vpop.permute.xlu2 %1030 }
0x179b   :  { %v1033_v47 = vmul.f32 %v1031_v45, %v1025_v46 }
0x179d   :  { %1035 = vrot.lane.b32.xlu0 %v1033_v47, %s1450_s28 }
0x180f   :  { %v1036_v49 = vpop.permute.xlu0 %1035 }
0x1810   :  { %v1038_v50 = vadd.f32 %v1036_v49, %v1028_v48 }
0x1812   :  { %1413 = vtanh.f32 %v1038_v50 }
0x1818   :  { %v1414_v51 = vpop.eup %1413 }
0x1819   :  { %1041 = vrot.lane.b32.xlu1 %v1414_v51, %s1449_s27 }
0x188b   :  { %v1042_v53 = vpop.permute.xlu1 %1041 }
0x188c   :  { %v1044_v54 = vmul.f32 %v1042_v53, %v1025_v46 }
0x188e   :  { %1046 = vrot.lane.b32.xlu2 %v1044_v54, %s1450_s28 }
0x18e8   :  { %v1047_v55 = vpop.permute.xlu2 %1046 }
0x18e9   :  { %1049 = vst.msk [vmem:[%s1904_s7 + $0x20] sm:$0xff] %vm45_vm0, %v1047_v55  ;;  %1305 = vmatmul.msk.f32.vlgmr.msra.gmra.mxu2 %vm45_vm0, %v1047_v55 }
0x196c   :  { %v1069_v58 = vpop.f32.mrf.mxu2 }
0x196d   :  { %v1072_v59 = vadd.f32 %v1069_v58, %v715_v57 }
0x196f   :  { %1415 = vtanh.f32 %v1072_v59  ;;  %v1306_v61 = vmul.f32 -1.442695, %v1072_v59 }
0x1971   :  { %1417 = vpow2.f32 %v1306_v61 }
0x1975   :  { %v1416_v60 = vpop.eup %1415 }
0x1976   :  { %1095 = vrot.lane.b32.xlu0 %v1416_v60, %s1449_s27 }
0x1977   :  { %v1418_v62 = vpop.eup %1417 }
0x1978   :  { %v1076_v63 = vadd.f32 1.0, %v1418_v62 }
0x197a   :  { %1419 = vrcp.f32 %v1076_v63  ;;  %v1088_v17 = vand.u32 2147483648, %v1076_v63  ;;  %vm1082_vm5 = vweird.f32 %v1076_v63  ;;  %v1086_v6 = vand.u32 2147483647, %v1076_v63 }
0x197b   :  { %1421 = vtanh.f32 %v593_v12 }
0x197c   :  { %v1089_v9 = vor.u32 1.1754944e-38, %v1088_v17  ;;  %vm1087_vm7 = vcmp.eq.f32.partialorder %v1086_v6, 8.507059e+37 }
0x1980   :  { %v1420_v0 = vpop.eup %1419 }
0x1981   :  { %v1078_v1 = vmul.f32 %v1420_v0, %v1076_v63  ;;  %vm1083_vm4 = vweird.f32 %v1420_v0  ;;  %v1422_v20 = vpop.eup %1421 }
0x1982   :  { %vm1084_vm6 = vmor %vm1082_vm5, %vm1083_vm4 }
0x1983   :  { %v1079_v13 = vsub.f32 1.0, %v1078_v1 }
0x1985   :  { %v1080_v14 = vmul.f32 %v1420_v0, %v1079_v13 }
0x1987   :  { %v1081_v16 = vadd.f32 %v1420_v0, %v1080_v14 }
0x1989   :  { %v1085_v11 = vsel %vm1084_vm6, %v1420_v0, %v1081_v16 }
0x198a   :  { %v1090_v3 = vsel %vm1087_vm7, %v1089_v9, %v1085_v11 }
0x198b   :  { %v1093_v21 = vmul.f32 %v1090_v3, %v1038_v50 }
0x19e8   :  { %v1096_v2 = vpop.permute.xlu0 %1095 }
0x19e9   :  { %v1098_v5 = vmul.f32 %v1096_v2, %v1090_v3 }
0x19eb   :  { %1100 = vrot.lane.b32.xlu1 %v1098_v5, %s1450_s28 }
0x19f3   :  { %616 = vrot.lane.b32.xlu1 %v1422_v20, %s1449_s27 }
0x1a5d   :  { %v1101_v10 = vpop.permute.xlu1 %1100 }
0x1a5e   :  { %v1839_v22 = vadd.f32 %v1101_v10, %v1093_v21 }
0x1a60   :  { %1423 = vtanh.f32 %v1839_v22 }
0x1a61   :  { %1425 = vpow2.f32 %v1287_v23 }
0x1a65   :  { %v617_v36 = vpop.permute.xlu1 %616 }
0x1a66   :  { %v1424_v7 = vpop.eup %1423 }
0x1a67   :  { %1106 = vrot.lane.b32.xlu2 %v1424_v7, %s1449_s27  ;;  %v1426_v4 = vpop.eup %1425 }
0x1a68   :  { %v597_v24 = vadd.f32 1.0, %v1426_v4 }
0x1a6a   :  { %1427 = vrcp.f32 %v597_v24  ;;  %v609_v32 = vand.u32 2147483648, %v597_v24  ;;  %vm603_vm9 = vweird.f32 %v597_v24  ;;  %v607_v33 = vand.u32 2147483647, %v597_v24 }
0x1a6c   :  { %v610_v35 = vor.u32 1.1754944e-38, %v609_v32  ;;  %vm608_vm11 = vcmp.eq.f32.partialorder %v607_v33, 8.507059e+37 }
0x1a70   :  { %v1428_v25 = vpop.eup %1427 }
0x1a71   :  { %v599_v26 = vmul.f32 %v1428_v25, %v597_v24  ;;  %vm604_vm8 = vweird.f32 %v1428_v25 }
0x1a72   :  { %vm605_vm10 = vmor %vm603_vm9, %vm604_vm8 }
0x1a73   :  { %v600_v27 = vsub.f32 1.0, %v599_v26 }
0x1a75   :  { %v601_v28 = vmul.f32 %v1428_v25, %v600_v27 }
0x1a77   :  { %v602_v30 = vadd.f32 %v1428_v25, %v601_v28 }
0x1a79   :  { %v606_v34 = vsel %vm605_vm10, %v1428_v25, %v602_v30 }
0x1a7a   :  { %v611_v37 = vsel %vm608_vm11, %v610_v35, %v606_v34 }
0x1a7b   :  { %v619_v38 = vmul.f32 %v617_v36, %v611_v37  ;;  %v614_v45 = vmul.f32 %v611_v37, %v1748_v52 }
0x1ac1   :  { %v1107_v29 = vpop.permute.xlu2 %1106 }
0x1ac2   :  { %v1109_v31 = vmul.f32 %v1107_v29, %v1090_v3 }
0x1ac4   :  { %1111 = vrot.lane.b32.xlu0 %v1109_v31, %s1450_s28 }
0x1acc   :  { %621 = vrot.lane.b32.xlu0 %v619_v38, %s1450_s28 }
0x1b36   :  { %v1112_v39 = vpop.permute.xlu0 %1111 }
0x1b37   :  { %1114 = vst.msk [vmem:[%s1904_s7 + $0x28] sm:$0xff] %vm45_vm0, %v1112_v39  ;;  %1307 = vmatmul.msk.f32.vlgmr.msrb.gmra.mxu1 %vm45_vm0, %v1112_v39 }
0x1b3e   :  { %v622_v44 = vpop.permute.xlu0 %621 }
0x1b3f   :  { %v624_v46 = vadd.f32 %v622_v44, %v614_v45 }
0x1bb4   :  { %v1134_v42 = vpop.f32.mrf.mxu1 }
0x1bb5   :  { %v1137_v43 = vadd.f32 %v1134_v42, %v718_v41 }
0x1bb7   :  { %1429 = vtanh.f32 %v1137_v43  ;;  %v1308_v49 = vmul.f32 -1.442695, %v1137_v43 }
0x1bb8   :  { %1431 = vtanh.f32 %v624_v46 }
0x1bb9   :  { %1433 = vpow2.f32 %v1308_v49 }
0x1bbd   :  { %v1430_v47 = vpop.eup %1429 }
0x1bbe   :  { %1160 = vrot.lane.b32.xlu2 %v1430_v47, %s1449_s27  ;;  %v1432_v48 = vpop.eup %1431 }
0x1bbf   :  { %v1434_v50 = vpop.eup %1433 }
0x1bc0   :  { %v1141_v51 = vadd.f32 1.0, %v1434_v50 }
0x1bc2   :  { %1435 = vrcp.f32 %v1141_v51  ;;  %v1153_v52 = vand.u32 2147483648, %v1141_v51  ;;  %vm1147_vm13 = vweird.f32 %v1141_v51  ;;  %v1151_v58 = vand.u32 2147483647, %v1141_v51 }
0x1bc4   :  { %v1154_v60 = vor.u32 1.1754944e-38, %v1153_v52  ;;  %vm1152_vm15 = vcmp.eq.f32.partialorder %v1151_v58, 8.507059e+37 }
0x1bc6   :  { %627 = vrot.lane.b32.xlu2 %v1432_v48, %s1449_s27 }
0x1bc8   :  { %v1436_v53 = vpop.eup %1435 }
0x1bc9   :  { %v1143_v54 = vmul.f32 %v1436_v53, %v1141_v51  ;;  %vm1148_vm12 = vweird.f32 %v1436_v53 }
0x1bca   :  { %vm1149_vm14 = vmor %vm1147_vm13, %vm1148_vm12 }
0x1bcb   :  { %v1144_v55 = vsub.f32 1.0, %v1143_v54 }
0x1bcd   :  { %v1145_v56 = vmul.f32 %v1436_v53, %v1144_v55 }
0x1bcf   :  { %v1146_v57 = vadd.f32 %v1436_v53, %v1145_v56 }
0x1bd1   :  { %v1150_v59 = vsel %vm1149_vm14, %v1436_v53, %v1146_v57 }
0x1bd2   :  { %v1155_v62 = vsel %vm1152_vm15, %v1154_v60, %v1150_v59 }
0x1bd3   :  { %v1158_v13 = vmul.f32 %v1155_v62, %v1839_v22 }
0x1c18   :  { %v1161_v61 = vpop.permute.xlu2 %1160 }
0x1c19   :  { %v1163_v63 = vmul.f32 %v1161_v61, %v1155_v62 }
0x1c1b   :  { %1165 = vrot.lane.b32.xlu1 %v1163_v63, %s1450_s28 }
0x1c20   :  { %v628_v0 = vpop.permute.xlu2 %627 }
0x1c21   :  { %v630_v1 = vmul.f32 %v628_v0, %v611_v37 }
0x1c23   :  { %632 = vrot.lane.b32.xlu1 %v630_v1, %s1450_s28 }
0x1c8d   :  { %v1166_v14 = vpop.permute.xlu1 %1165 }
0x1c8e   :  { %v1168_v15 = vadd.f32 %v1166_v14, %v1158_v13 }
0x1c90   :  { %1437 = vtanh.f32 %v1168_v15 }
0x1c95   :  { %v633_v16 = vpop.permute.xlu1 %632 }
0x1c96   :  { %v1438_v17 = vpop.eup %1437  ;;  %635 = vst.msk [vmem:[%s1904_s7 + $0x38] sm:$0xff] %vm45_vm0, %v633_v16 }
0x1c97   :  { %636 = vst.msk [vmem:[%s1907_s8] sm:$0xff] %vm45_vm0, %v633_v16  ;;  %1171 = vrot.lane.b32.xlu0 %v1438_v17, %s1449_s27 }
0x1c9d   :  { %v649_v6 = vld [vmem:[%s1904_s7 + $0x38] sm:$0xff] }
0x1c9e   :  { %1295 = vmatmul.msk.f32.gmra.mxu3 %vm45_vm0, %v649_v6 }
0x1d09   :  { %v1172_v8 = vpop.permute.xlu0 %1171 }
0x1d0a   :  { %v1174_v18 = vmul.f32 %v1172_v8, %v1155_v62 }
0x1d0c   :  { %1176 = vrot.lane.b32.xlu2 %v1174_v18, %s1450_s28 }
0x1d21   :  { %v720_v9 = vpop.f32.mrf.mxu3 }
0x1d22   :  { %v721_v12 = vadd.f32 %v1740_v19, %v720_v9 }
0x1d66   :  { %v1177_v11 = vpop.permute.xlu2 %1176 }
0x1d67   :  { %1179 = vst.msk [vmem:[%s1904_s7 + $0x30] sm:$0xff] %vm45_vm0, %v1177_v11  ;;  %1309 = vmatmul.msk.f32.vlgmr.msrb.gmra.mxu2 %vm45_vm0, %v1177_v11 }
0x1dea   :  { %v1199_v2 = vpop.f32.mrf.mxu2 }
0x1deb   :  { %v1202_v3 = vadd.f32 %v1199_v2, %v721_v12 }
0x1ded   :  { %1439 = vtanh.f32 %v1202_v3  ;;  %v1310_v20 = vmul.f32 -1.442695, %v1202_v3 }
0x1def   :  { %1441 = vpow2.f32 %v1310_v20 }
0x1df3   :  { %v1440_v5 = vpop.eup %1439 }
0x1df4   :  { %1225 = vrot.lane.b32.xlu0 %v1440_v5, %s1449_s27 }
0x1df5   :  { %v1442_v21 = vpop.eup %1441 }
0x1df6   :  { %v1206_v10 = vadd.f32 1.0, %v1442_v21 }
0x1df8   :  { %1443 = vrcp.f32 %v1206_v10  ;;  %v1218_v19 = vand.u32 2147483648, %v1206_v10  ;;  %vm1212_vm2 = vweird.f32 %v1206_v10  ;;  %v1216_v25 = vand.u32 2147483647, %v1206_v10 }
0x1dfa   :  { %v1219_v27 = vor.u32 1.1754944e-38, %v1218_v19  ;;  %vm1217_vm4 = vcmp.eq.f32.partialorder %v1216_v25, 8.507059e+37 }
0x1dfc   :  { %638 = vrot.lane.b32.xlu0 %v624_v46, %s1451_s18 }
0x1dfe   :  { %v1444_v22 = vpop.eup %1443 }
0x1dff   :  { %v1208_v7 = vmul.f32 %v1444_v22, %v1206_v10  ;;  %vm1213_vm1 = vweird.f32 %v1444_v22 }
0x1e00   :  { %vm1214_vm3 = vmor %vm1212_vm2, %vm1213_vm1 }
0x1e01   :  { %v1209_v23 = vsub.f32 1.0, %v1208_v7 }
0x1e03   :  { %v1210_v4 = vmul.f32 %v1444_v22, %v1209_v23 }
0x1e05   :  { %v1211_v24 = vadd.f32 %v1444_v22, %v1210_v4 }
0x1e07   :  { %v1215_v26 = vsel %vm1214_vm3, %v1444_v22, %v1211_v24 }
0x1e08   :  { %v1220_v29 = vsel %vm1217_vm4, %v1219_v27, %v1215_v26 }
0x1e09   :  { %v1223_v32 = vmul.f32 %v1220_v29, %v1168_v15 }
0x1e66   :  { %v1226_v28 = vpop.permute.xlu0 %1225 }
0x1e67   :  { %v1228_v30 = vmul.f32 %v1226_v28, %v1220_v29 }
0x1e69   :  { %1230 = vrot.lane.b32.xlu1 %v1228_v30, %s1450_s28 }
0x1e6e   :  { %v639_v31 = vpop.permute.xlu0 %638 }
0x1e6f   :  { %641 = vst.msk [vmem:[%s1908_s9] sm:$0xff] %vm45_vm0, %v639_v31 }
0x1edb   :  { %v1231_v33 = vpop.permute.xlu1 %1230 }
0x1edc   :  { %v1233_v34 = vadd.f32 %v1231_v33, %v1223_v32 }
0x1ede   :  { %1445 = vtanh.f32 %v1233_v34 }
0x1ee4   :  { %v1446_v35 = vpop.eup %1445 }
0x1ee5   :  { %1236 = vrot.lane.b32.xlu2 %v1446_v35, %s1449_s27 }
0x1eed   :  { %1248 = vrot.lane.b32.xlu2 %v1233_v34, %s1451_s18 }
0x1f3f   :  { %v1237_v36 = vpop.permute.xlu2 %1236 }
0x1f40   :  { %v1239_v37 = vmul.f32 %v1237_v36, %v1220_v29 }
0x1f42   :  { %1241 = vrot.lane.b32.xlu1 %v1239_v37, %s1450_s28 }
0x1f47   :  { %v1249_v38 = vpop.permute.xlu2 %1248 }
0x1f48   :  { %1312 = vst.msk [vmem:[%s1908_s9 + $0x8] sm:$0xff] %vm45_vm0, %v1249_v38 }
0x1fb4   :  { %v1242_v39 = vpop.permute.xlu1 %1241 }
0x1fb5   :  { %1244 = vst.msk [vmem:[%s1904_s7 + $0x38] sm:$0xff] %vm45_vm0, %v1242_v39 }
0x1fb6   :  { %1311 = vst.msk [vmem:[%s1907_s8 + $0x8] sm:$0xff] %vm45_vm0, %v1242_v39 }

</bundles_post_ra>
